<compile_context>
chip_gen: v7x
topology: tpu7x:2x2x1
jax: 0.10.0
libtpu: 0.0.40
codegen_flags: <defaults>
</compile_context>

<pallas_src>
import functools

import jax
import jax.numpy as jnp
import numpy as np
from jax import lax
from jax.experimental import pallas as pl
from jax.experimental.pallas import tpu as pltpu


# --------------------------------------------------------------------------
# Fused Pallas kernel (one batch element per grid step)
# --------------------------------------------------------------------------
def _extractor_kernel(*refs, P, Hp, Wp, nums_rb, down, pad_l):
    i = 0
    x_ref = refs[i]; i += 1
    if down:
        pw_ref = refs[i]; i += 1                      # (W, Wp) pooling operator
    in_w_ref, in_b_ref = refs[i], refs[i + 1]; i += 2
    rb_refs = [refs[i + 4 * r: i + 4 * r + 4] for r in range(nums_rb)]
    i += 4 * nums_rb
    out_w_ref, out_b_ref = refs[i], refs[i + 1]; i += 2
    o_ref = refs[i]; i += 1
    pad_ref = refs[i]; i += 1                         # (C_inter, pad_l+P+pad_l) bf16
    pool_ref = refs[i] if down else None              # (C_in, P) f32

    c_inter = in_w_ref.shape[0]
    pad_cols = pad_ref.shape[1]

    def mxu_dot(a, b):
        # bf16 MXU matmul with f32 accumulation (review: bf16 operands).
        return jnp.dot(a.astype(jnp.bfloat16), b.astype(jnp.bfloat16),
                       preferred_element_type=jnp.float32)

    # Column-index (j = p % Wp) masks for the W boundary of the 3x3 convs.
    col = lax.broadcasted_iota(jnp.int32, (1, P), 1) % Wp
    left_ok = col != 0                     # pixel (i, j-1) exists
    right_ok = col != (Wp - 1)             # pixel (i, j+1) exists

    # Zero ONLY the halo columns once per grid step; the interior is fully
    # rewritten before every conv (review: don't zero the whole buffer).
    pad_ref[:, pl.ds(0, pad_l)] = jnp.zeros((c_inter, pad_l), pad_ref.dtype)
    pad_ref[:, pl.ds(pad_l + P, pad_l)] = jnp.zeros((c_inter, pad_l),
                                                    pad_ref.dtype)

    # --- AvgPool2d(2,2), channel-major (replaces the dense pooling matrix) --
    if down:
        # Per output row: VPU add of the two source rows, then one tiny
        # (C_in, W) x (W, Wp) matmul folds the horizontal 2-tap average
        # (operator holds 0.25 at (2j, j) and (2j+1, j)).
        for r in range(Hp):
            rows = x_ref[0, :, 2 * r, :] + x_ref[0, :, 2 * r + 1, :]
            pool_ref[:, pl.ds(r * Wp, Wp)] = jnp.dot(
                rows, pw_ref[...], preferred_element_type=jnp.float32)
        xin = pool_ref[...]                          # (C_in, P) f32
    else:
        xin = x_ref[0]                               # (C_in, P) channel-major

    # --- 1x1 in_conv (channel-major; no transposes anywhere) ---------------
    x = mxu_dot(in_w_ref[...], xin) + in_b_ref[...]  # (C_inter, P) f32

    # --- 3x3 conv as 9 accumulating tap matmuls ----------------------------
    def conv3x3(v, w_ref, b_ref, relu):
        # Stage v once (bf16) into the flattened, W-halo-padded image buffer;
        # each tap is then a static lane-offset window load + one MXU matmul.
        pad_ref[:, pl.ds(pad_l, P)] = v.astype(jnp.bfloat16)
        acc = None
        k = 0
        for dy in (-1, 0, 1):
            for dx in (-1, 0, 1):
                tap = pad_ref[:, pl.ds(pad_l + dy * Wp + dx, P)]  # (C, P) bf16
                if dx == -1:
                    tap = jnp.where(left_ok, tap, 0.0)
                elif dx == 1:
                    tap = jnp.where(right_ok, tap, 0.0)
                t = jnp.dot(w_ref[k], tap, preferred_element_type=jnp.float32)
                acc = t if acc is None else acc + t
                k += 1
        y = acc + b_ref[...]                          # f32 bias add
        if relu:
            y = jnp.maximum(y, 0.0)
        return y

    # ResnetBlock_light x nums_rb
    for r in range(nums_rb):
        w1_ref, b1_ref, w2_ref, b2_ref = rb_refs[r]
        h = conv3x3(x, w1_ref, b1_ref, relu=True)
        h = conv3x3(h, w2_ref, b2_ref, relu=False)
        x = x + h                                     # f32 residual

    # --- 1x1 out_conv: result is already channel-major == NCHW-flat --------
    o_ref[0] = (mxu_dot(out_w_ref[...], x) + out_b_ref[...]).astype(o_ref.dtype)


# --------------------------------------------------------------------------
# Wrapper
# --------------------------------------------------------------------------
def _wpool_operator(W):
    """(W, W//2) operator: 0.25 at (2j, j), (2j+1, j) -> horizontal average."""
    Wp = W // 2
    op = np.zeros((W, Wp), np.float32)
    for j in range(Wp):
        op[2 * j, j] = 0.25
        op[2 * j + 1, j] = 0.25
    return op


def _hwio_to_taps(w_hwio):
    """(3,3,Cin,Cout) HWIO -> (9, Cout, Cin) bf16, tap order = (ky, kx)."""
    kh, kw, cin, cout = w_hwio.shape
    return (jnp.transpose(w_hwio, (0, 1, 3, 2))
            .reshape(kh * kw, cout, cin).astype(jnp.bfloat16))


def extractor_forward(x_nchw, params, *, nums_rb, down=True,
                      vmem_limit_bytes=None):
    N, C_in, H, W = x_nchw.shape
    C_inter = params["in_w"].shape[1]
    C_out = params["out_w"].shape[1]
    if down:
        assert H % 2 == 0 and W % 2 == 0, "down=True expects even H, W"
        Hp, Wp = H // 2, W // 2
    else:
        Hp, Wp = H, W
    P = Hp * Wp
    pad_l = Wp + 8                      # >= Wp + 1 halo for (dy=-1, dx=-1) tap
    pad_cols = P + 2 * pad_l

    inputs, in_specs = [], []

    if down:
        inputs.append(x_nchw)           # NCHW 4D; row pairs read in-kernel
        in_specs.append(pl.BlockSpec((1, C_in, H, W), lambda n: (n, 0, 0, 0)))
    else:
        inputs.append(x_nchw.reshape(N, C_in, H * W))   # free reshape
        in_specs.append(pl.BlockSpec((1, C_in, H * W), lambda n: (n, 0, 0)))

    def add_const(arr):
        nd = arr.ndim
        inputs.append(arr)
        in_specs.append(pl.BlockSpec(arr.shape, lambda n, _nd=nd: (0,) * _nd))

    if down:
        add_const(jnp.asarray(_wpool_operator(W)))                   # (W, Wp)
    add_const(jnp.transpose(params["in_w"]).astype(jnp.bfloat16))    # (Ci, Cin)
    add_const(params["in_b"].reshape(C_inter, 1))                    # f32
    for r in range(nums_rb):
        w1, b1, w2, b2 = params["rb"][r]
        add_const(_hwio_to_taps(w1))                                 # (9,Ci,Ci)
        add_const(b1.reshape(C_inter, 1))
        add_const(_hwio_to_taps(w2))
        add_const(b2.reshape(C_inter, 1))
    add_const(jnp.transpose(params["out_w"]).astype(jnp.bfloat16))   # (Co, Ci)
    add_const(params["out_b"].reshape(C_out, 1))

    scratch = [pltpu.VMEM((C_inter, pad_cols), jnp.bfloat16)]        # halo buf
    if down:
        scratch.append(pltpu.VMEM((C_in, P), jnp.float32))           # pooled x

    kern = functools.partial(_extractor_kernel, P=P, Hp=Hp, Wp=Wp,
                             nums_rb=nums_rb, down=down, pad_l=pad_l)

    # vmem_limit_bytes left at the backend default for these toy shapes; set
    # it per TPU generation (<=~100 MiB v5e/v6e, <=~56 MiB v7x) for
    # production tiles.
    cp_kwargs = dict(dimension_semantics=("parallel",))
    if vmem_limit_bytes is not None:
        cp_kwargs["vmem_limit_bytes"] = vmem_limit_bytes

    out_flat = pl.pallas_call(
        kern,
        out_shape=jax.ShapeDtypeStruct((N, C_out, P), jnp.float32),
        grid=(N,),
        in_specs=in_specs,
        out_specs=pl.BlockSpec((1, C_out, P), lambda n: (n, 0, 0)),
        scratch_shapes=scratch,
        compiler_params=pltpu.CompilerParams(**cp_kwargs),
    )(*inputs)

    return out_flat.reshape(N, C_out, Hp, Wp)


# --------------------------------------------------------------------------
# Pure-JAX reference (for the correctness check)
# --------------------------------------------------------------------------
def _conv3x3_ref(x_nhwc, w_hwio, b):
    y = lax.conv_general_dilated(
        x_nhwc, w_hwio, (1, 1), ((1, 1), (1, 1)),
        dimension_numbers=("NHWC", "HWIO", "NHWC"),
        precision=lax.Precision.HIGHEST)
    return y + b.reshape(1, 1, 1, -1)


def extractor_ref(x_nchw, params, *, nums_rb, down=True):
    x = jnp.transpose(x_nchw, (0, 2, 3, 1))                # NCHW -> NHWC
    if down:
        N, H, W, C = x.shape
        x = x.reshape(N, H // 2, 2, W // 2, 2, C).mean(axis=(2, 4))
    hi = lax.Precision.HIGHEST
    x = jnp.einsum("nhwc,cd->nhwd", x, params["in_w"],
                   precision=hi) + params["in_b"].reshape(1, 1, 1, -1)
    for r in range(nums_rb):
        w1, b1, w2, b2 = params["rb"][r]
        h = jnp.maximum(_conv3x3_ref(x, w1, b1), 0.0)
        h = _conv3x3_ref(h, w2, b2)
        x = x + h
    x = jnp.einsum("nhwc,cd->nhwd", x, params["out_w"],
                   precision=hi) + params["out_b"].reshape(1, 1, 1, -1)
    return jnp.transpose(x, (0, 3, 1, 2))                  # NHWC -> NCHW


# --------------------------------------------------------------------------
# Deterministic synthetic parameters (shapes from the module __init__)
# --------------------------------------------------------------------------
def init_params(key, in_c, inter_c, out_c, nums_rb):
    ks = jax.random.split(key, 4 + 4 * nums_rb)
    idx = iter(range(4 + 4 * nums_rb))

    def w3(k, cin, cout):       # HWIO 3x3 conv weight
        return (jax.random.normal(k, (3, 3, cin, cout), jnp.float32)
                / jnp.sqrt(9.0 * cin))

    def w1(k, cin, cout):       # 1x1 conv weight as (Cin, Cout) matrix
        return jax.random.normal(k, (cin, cout), jnp.float32) / jnp.sqrt(1.0 * cin)

    def bias(k, c):
        return jax.random.normal(k, (1, c), jnp.float32) * 0.01

    params = {
        "in_w": w1(ks[next(idx)], in_c, inter_c),
        "in_b": bias(ks[next(idx)], inter_c),
        "rb": [],
    }
    for _ in range(nums_rb):
        params["rb"].append((
            w3(ks[next(idx)], inter_c, inter_c), bias(ks[next(idx)], inter_c),
            w3(ks[next(idx)], inter_c, inter_c), bias(ks[next(idx)], inter_c)))
    params["out_w"] = w1(ks[next(idx)], inter_c, out_c)
    params["out_b"] = bias(ks[next(idx)], out_c)
    return params


if __name__ == "__main__":
    key = jax.random.PRNGKey(0)
    k_x, k_p = jax.random.split(key)

    N, C_IN, H, W = 2, 4, 16, 16
    C_INTER, C_OUT, NUMS_RB, DOWN = 8, 8, 2, True

    x = jax.random.normal(k_x, (N, C_IN, H, W), jnp.float32)
    params = init_params(k_p, C_IN, C_INTER, C_OUT, NUMS_RB)

    out = extractor_forward(x, params, nums_rb=NUMS_RB, down=DOWN)
    out = jax.block_until_ready(out)

    ref = extractor_ref(x, params, nums_rb=NUMS_RB, down=DOWN)
    assert out.shape == (N, C_OUT, H // 2, W // 2), out.shape
    # bf16 matmul operands (f32 accumulation) -> looser tolerance than f32.
    np.testing.assert_allclose(np.asarray(out), np.asarray(ref),
                               rtol=5e-2, atol=5e-2)

    print("KERNEL_OK")
</pallas_src>

<mosaic_0001>
module attributes {stable_mosaic.version = 11 : i64} {
  func.func @_extractor_kernel(%arg0: i32, %arg1: memref<1x4x16x16xf32, #tpu.memory_space<vmem>>, %arg2: memref<16x8xf32, #tpu.memory_space<vmem>>, %arg3: memref<8x4xbf16, #tpu.memory_space<vmem>>, %arg4: memref<8x1xf32, #tpu.memory_space<vmem>>, %arg5: memref<9x8x8xbf16, #tpu.memory_space<vmem>>, %arg6: memref<8x1xf32, #tpu.memory_space<vmem>>, %arg7: memref<9x8x8xbf16, #tpu.memory_space<vmem>>, %arg8: memref<8x1xf32, #tpu.memory_space<vmem>>, %arg9: memref<9x8x8xbf16, #tpu.memory_space<vmem>>, %arg10: memref<8x1xf32, #tpu.memory_space<vmem>>, %arg11: memref<9x8x8xbf16, #tpu.memory_space<vmem>>, %arg12: memref<8x1xf32, #tpu.memory_space<vmem>>, %arg13: memref<8x8xbf16, #tpu.memory_space<vmem>>, %arg14: memref<8x1xf32, #tpu.memory_space<vmem>>, %arg15: memref<1x8x64xf32, #tpu.memory_space<vmem>>, %arg16: memref<8x96xbf16, #tpu.memory_space<vmem>>, %arg17: memref<4x64xf32, #tpu.memory_space<vmem>>) attributes {dimension_semantics = [#tpu.dimension_semantics<parallel>], iteration_bounds = array<i64: 2>, scalar_prefetch = 0 : i64, scratch_operands = 2 : i64, tpu.core_type = #tpu.core_type<tc>, window_params = [{transform_indices = @transform_0, window_bounds = array<i64: 1, 4, 16, 16>}, {pipeline_mode = #tpu.pipeline_mode<synchronous>, transform_indices = @transform_1, window_bounds = array<i64: 16, 8>}, {pipeline_mode = #tpu.pipeline_mode<synchronous>, transform_indices = @transform_2, window_bounds = array<i64: 8, 4>}, {pipeline_mode = #tpu.pipeline_mode<synchronous>, transform_indices = @transform_3, window_bounds = array<i64: 8, 1>}, {pipeline_mode = #tpu.pipeline_mode<synchronous>, transform_indices = @transform_4, window_bounds = array<i64: 9, 8, 8>}, {pipeline_mode = #tpu.pipeline_mode<synchronous>, transform_indices = @transform_5, window_bounds = array<i64: 8, 1>}, {pipeline_mode = #tpu.pipeline_mode<synchronous>, transform_indices = @transform_6, window_bounds = array<i64: 9, 8, 8>}, {pipeline_mode = #tpu.pipeline_mode<synchronous>, transform_indices = @transform_7, window_bounds = array<i64: 8, 1>}, {pipeline_mode = #tpu.pipeline_mode<synchronous>, transform_indices = @transform_8, window_bounds = array<i64: 9, 8, 8>}, {pipeline_mode = #tpu.pipeline_mode<synchronous>, transform_indices = @transform_9, window_bounds = array<i64: 8, 1>}, {pipeline_mode = #tpu.pipeline_mode<synchronous>, transform_indices = @transform_10, window_bounds = array<i64: 9, 8, 8>}, {pipeline_mode = #tpu.pipeline_mode<synchronous>, transform_indices = @transform_11, window_bounds = array<i64: 8, 1>}, {pipeline_mode = #tpu.pipeline_mode<synchronous>, transform_indices = @transform_12, window_bounds = array<i64: 8, 8>}, {pipeline_mode = #tpu.pipeline_mode<synchronous>, transform_indices = @transform_13, window_bounds = array<i64: 8, 1>}, {transform_indices = @transform_14, window_bounds = array<i64: 1, 8, 64>}]} {
    %0 = tpu.iota {dimensions = array<i32: 1>} : vector<1x64xi32>
    %c8_i32 = arith.constant 8 : i32
    %c0_i32 = arith.constant 0 : i32
    %1 = arith.cmpi eq, %c8_i32, %c0_i32 : i32
    %c1_i32 = arith.constant 1 : i32
    %2 = arith.select %1, %c1_i32, %c8_i32 : i32
    %3 = vector.broadcast %2 : i32 to vector<1x64xi32>
    %4 = arith.remsi %0, %3 : vector<1x64xi32>
    %c0_i32_0 = arith.constant 0 : i32
    %5 = vector.broadcast %c0_i32_0 : i32 to vector<1x64xi32>
    %6 = arith.cmpi ne, %4, %5 : vector<1x64xi32>
    %c0_i32_1 = arith.constant 0 : i32
    %7 = vector.broadcast %c0_i32_1 : i32 to vector<1x64xi32>
    %8 = arith.cmpi slt, %4, %7 : vector<1x64xi32>
    %c0_i32_2 = arith.constant 0 : i32
    %9 = arith.cmpi slt, %2, %c0_i32_2 : i32
    %10 = vector.broadcast %9 : i1 to vector<1x64xi1>
    %11 = vector.broadcast %10 : vector<1x64xi1> to vector<1x64xi1>
    %12 = arith.xori %8, %11 : vector<1x64xi1>
    %13 = arith.andi %12, %6 : vector<1x64xi1>
    %14 = vector.broadcast %2 : i32 to vector<1x64xi32>
    %15 = arith.addi %4, %14 : vector<1x64xi32>
    %16 = arith.select %13, %15, %4 : vector<1x64xi1>, vector<1x64xi32>
    %c0_i32_3 = arith.constant 0 : i32
    %17 = vector.broadcast %c0_i32_3 : i32 to vector<1x64xi32>
    %18 = arith.cmpi ne, %16, %17 : vector<1x64xi32>
    %c7_i32 = arith.constant 7 : i32
    %19 = vector.broadcast %c7_i32 : i32 to vector<1x64xi32>
    %20 = arith.cmpi ne, %16, %19 : vector<1x64xi32>
    %cst = arith.constant 0.000000e+00 : bf16
    %21 = vector.broadcast %cst : bf16 to vector<8x16xbf16>
    %c0 = arith.constant 0 : index
    %c0_4 = arith.constant 0 : index
    %22 = vector.load %arg16[%c0, %c0_4] : memref<8x96xbf16, #tpu.memory_space<vmem>>, vector<8x16xbf16>
    tpu.vector_store %arg16[%c0, %c0_4], %21 {strides = array<i32>} : memref<8x96xbf16, #tpu.memory_space<vmem>>, vector<8x16xbf16>,
    %cst_5 = arith.constant 0.000000e+00 : bf16
    %23 = vector.broadcast %cst_5 : bf16 to vector<8x16xbf16>
    %c0_6 = arith.constant 0 : index
    %c80 = arith.constant 80 : index
    %24 = vector.load %arg16[%c0_6, %c80] : memref<8x96xbf16, #tpu.memory_space<vmem>>, vector<8x16xbf16>
    tpu.vector_store %arg16[%c0_6, %c80], %23 {strides = array<i32>} : memref<8x96xbf16, #tpu.memory_space<vmem>>, vector<8x16xbf16>,
    %c0_7 = arith.constant 0 : index
    %c0_8 = arith.constant 0 : index
    %c0_9 = arith.constant 0 : index
    %c0_10 = arith.constant 0 : index
    %25 = vector.load %arg1[%c0_7, %c0_8, %c0_9, %c0_10] : memref<1x4x16x16xf32, #tpu.memory_space<vmem>>, vector<1x4x1x16xf32>
    %26 = vector.shape_cast %25 : vector<1x4x1x16xf32> to vector<4x16xf32>
    %c0_11 = arith.constant 0 : index
    %c0_12 = arith.constant 0 : index
    %c1 = arith.constant 1 : index
    %c0_13 = arith.constant 0 : index
    %27 = vector.load %arg1[%c0_11, %c0_12, %c1, %c0_13] : memref<1x4x16x16xf32, #tpu.memory_space<vmem>>, vector<1x4x1x16xf32>
    %28 = vector.shape_cast %27 : vector<1x4x1x16xf32> to vector<4x16xf32>
    %29 = arith.addf %26, %28 : vector<4x16xf32>
    %c0_14 = arith.constant 0 : index
    %c0_15 = arith.constant 0 : index
    %30 = vector.load %arg2[%c0_14, %c0_15] : memref<16x8xf32, #tpu.memory_space<vmem>>, vector<16x8xf32>
    %cst_16 = arith.constant dense<0.000000e+00> : vector<4x8xf32>
    %31 = tpu.matmul %29, %30, %cst_16 {dimension_numbers = #tpu.dot_dimension_numbers<[1], [0], [0], [1], [0, 0, 1, 1], [], []>} : vector<4x16xf32>, vector<16x8xf32>, vector<4x8xf32> -> vector<4x8xf32>
    %c0_17 = arith.constant 0 : index
    %c0_18 = arith.constant 0 : index
    %32 = vector.load %arg17[%c0_17, %c0_18] : memref<4x64xf32, #tpu.memory_space<vmem>>, vector<4x8xf32>
    tpu.vector_store %arg17[%c0_17, %c0_18], %31 {strides = array<i32>} : memref<4x64xf32, #tpu.memory_space<vmem>>, vector<4x8xf32>,
    %c0_19 = arith.constant 0 : index
    %c0_20 = arith.constant 0 : index
    %c2 = arith.constant 2 : index
    %c0_21 = arith.constant 0 : index
    %33 = vector.load %arg1[%c0_19, %c0_20, %c2, %c0_21] : memref<1x4x16x16xf32, #tpu.memory_space<vmem>>, vector<1x4x1x16xf32>
    %34 = vector.shape_cast %33 : vector<1x4x1x16xf32> to vector<4x16xf32>
    %c0_22 = arith.constant 0 : index
    %c0_23 = arith.constant 0 : index
    %c3 = arith.constant 3 : index
    %c0_24 = arith.constant 0 : index
    %35 = vector.load %arg1[%c0_22, %c0_23, %c3, %c0_24] : memref<1x4x16x16xf32, #tpu.memory_space<vmem>>, vector<1x4x1x16xf32>
    %36 = vector.shape_cast %35 : vector<1x4x1x16xf32> to vector<4x16xf32>
    %37 = arith.addf %34, %36 : vector<4x16xf32>
    %c0_25 = arith.constant 0 : index
    %c0_26 = arith.constant 0 : index
    %38 = vector.load %arg2[%c0_25, %c0_26] : memref<16x8xf32, #tpu.memory_space<vmem>>, vector<16x8xf32>
    %cst_27 = arith.constant dense<0.000000e+00> : vector<4x8xf32>
    %39 = tpu.matmul %37, %38, %cst_27 {dimension_numbers = #tpu.dot_dimension_numbers<[1], [0], [0], [1], [0, 0, 1, 1], [], []>} : vector<4x16xf32>, vector<16x8xf32>, vector<4x8xf32> -> vector<4x8xf32>
    %c0_28 = arith.constant 0 : index
    %c8 = arith.constant 8 : index
    %40 = vector.load %arg17[%c0_28, %c8] : memref<4x64xf32, #tpu.memory_space<vmem>>, vector<4x8xf32>
    tpu.vector_store %arg17[%c0_28, %c8], %39 {strides = array<i32>} : memref<4x64xf32, #tpu.memory_space<vmem>>, vector<4x8xf32>,
    %c0_29 = arith.constant 0 : index
    %c0_30 = arith.constant 0 : index
    %c4 = arith.constant 4 : index
    %c0_31 = arith.constant 0 : index
    %41 = vector.load %arg1[%c0_29, %c0_30, %c4, %c0_31] : memref<1x4x16x16xf32, #tpu.memory_space<vmem>>, vector<1x4x1x16xf32>
    %42 = vector.shape_cast %41 : vector<1x4x1x16xf32> to vector<4x16xf32>
    %c0_32 = arith.constant 0 : index
    %c0_33 = arith.constant 0 : index
    %c5 = arith.constant 5 : index
    %c0_34 = arith.constant 0 : index
    %43 = vector.load %arg1[%c0_32, %c0_33, %c5, %c0_34] : memref<1x4x16x16xf32, #tpu.memory_space<vmem>>, vector<1x4x1x16xf32>
    %44 = vector.shape_cast %43 : vector<1x4x1x16xf32> to vector<4x16xf32>
    %45 = arith.addf %42, %44 : vector<4x16xf32>
    %c0_35 = arith.constant 0 : index
    %c0_36 = arith.constant 0 : index
    %46 = vector.load %arg2[%c0_35, %c0_36] : memref<16x8xf32, #tpu.memory_space<vmem>>, vector<16x8xf32>
    %cst_37 = arith.constant dense<0.000000e+00> : vector<4x8xf32>
    %47 = tpu.matmul %45, %46, %cst_37 {dimension_numbers = #tpu.dot_dimension_numbers<[1], [0], [0], [1], [0, 0, 1, 1], [], []>} : vector<4x16xf32>, vector<16x8xf32>, vector<4x8xf32> -> vector<4x8xf32>
    %c0_38 = arith.constant 0 : index
    %c16 = arith.constant 16 : index
    %48 = vector.load %arg17[%c0_38, %c16] : memref<4x64xf32, #tpu.memory_space<vmem>>, vector<4x8xf32>
    tpu.vector_store %arg17[%c0_38, %c16], %47 {strides = array<i32>} : memref<4x64xf32, #tpu.memory_space<vmem>>, vector<4x8xf32>,
    %c0_39 = arith.constant 0 : index
    %c0_40 = arith.constant 0 : index
    %c6 = arith.constant 6 : index
    %c0_41 = arith.constant 0 : index
    %49 = vector.load %arg1[%c0_39, %c0_40, %c6, %c0_41] : memref<1x4x16x16xf32, #tpu.memory_space<vmem>>, vector<1x4x1x16xf32>
    %50 = vector.shape_cast %49 : vector<1x4x1x16xf32> to vector<4x16xf32>
    %c0_42 = arith.constant 0 : index
    %c0_43 = arith.constant 0 : index
    %c7 = arith.constant 7 : index
    %c0_44 = arith.constant 0 : index
    %51 = vector.load %arg1[%c0_42, %c0_43, %c7, %c0_44] : memref<1x4x16x16xf32, #tpu.memory_space<vmem>>, vector<1x4x1x16xf32>
    %52 = vector.shape_cast %51 : vector<1x4x1x16xf32> to vector<4x16xf32>
    %53 = arith.addf %50, %52 : vector<4x16xf32>
    %c0_45 = arith.constant 0 : index
    %c0_46 = arith.constant 0 : index
    %54 = vector.load %arg2[%c0_45, %c0_46] : memref<16x8xf32, #tpu.memory_space<vmem>>, vector<16x8xf32>
    %cst_47 = arith.constant dense<0.000000e+00> : vector<4x8xf32>
    %55 = tpu.matmul %53, %54, %cst_47 {dimension_numbers = #tpu.dot_dimension_numbers<[1], [0], [0], [1], [0, 0, 1, 1], [], []>} : vector<4x16xf32>, vector<16x8xf32>, vector<4x8xf32> -> vector<4x8xf32>
    %c0_48 = arith.constant 0 : index
    %c24 = arith.constant 24 : index
    %56 = vector.load %arg17[%c0_48, %c24] : memref<4x64xf32, #tpu.memory_space<vmem>>, vector<4x8xf32>
    tpu.vector_store %arg17[%c0_48, %c24], %55 {strides = array<i32>} : memref<4x64xf32, #tpu.memory_space<vmem>>, vector<4x8xf32>,
    %c0_49 = arith.constant 0 : index
    %c0_50 = arith.constant 0 : index
    %c8_51 = arith.constant 8 : index
    %c0_52 = arith.constant 0 : index
    %57 = vector.load %arg1[%c0_49, %c0_50, %c8_51, %c0_52] : memref<1x4x16x16xf32, #tpu.memory_space<vmem>>, vector<1x4x1x16xf32>
    %58 = vector.shape_cast %57 : vector<1x4x1x16xf32> to vector<4x16xf32>
    %c0_53 = arith.constant 0 : index
    %c0_54 = arith.constant 0 : index
    %c9 = arith.constant 9 : index
    %c0_55 = arith.constant 0 : index
    %59 = vector.load %arg1[%c0_53, %c0_54, %c9, %c0_55] : memref<1x4x16x16xf32, #tpu.memory_space<vmem>>, vector<1x4x1x16xf32>
    %60 = vector.shape_cast %59 : vector<1x4x1x16xf32> to vector<4x16xf32>
    %61 = arith.addf %58, %60 : vector<4x16xf32>
    %c0_56 = arith.constant 0 : index
    %c0_57 = arith.constant 0 : index
    %62 = vector.load %arg2[%c0_56, %c0_57] : memref<16x8xf32, #tpu.memory_space<vmem>>, vector<16x8xf32>
    %cst_58 = arith.constant dense<0.000000e+00> : vector<4x8xf32>
    %63 = tpu.matmul %61, %62, %cst_58 {dimension_numbers = #tpu.dot_dimension_numbers<[1], [0], [0], [1], [0, 0, 1, 1], [], []>} : vector<4x16xf32>, vector<16x8xf32>, vector<4x8xf32> -> vector<4x8xf32>
    %c0_59 = arith.constant 0 : index
    %c32 = arith.constant 32 : index
    %64 = vector.load %arg17[%c0_59, %c32] : memref<4x64xf32, #tpu.memory_space<vmem>>, vector<4x8xf32>
    tpu.vector_store %arg17[%c0_59, %c32], %63 {strides = array<i32>} : memref<4x64xf32, #tpu.memory_space<vmem>>, vector<4x8xf32>,
    %c0_60 = arith.constant 0 : index
    %c0_61 = arith.constant 0 : index
    %c10 = arith.constant 10 : index
    %c0_62 = arith.constant 0 : index
    %65 = vector.load %arg1[%c0_60, %c0_61, %c10, %c0_62] : memref<1x4x16x16xf32, #tpu.memory_space<vmem>>, vector<1x4x1x16xf32>
    %66 = vector.shape_cast %65 : vector<1x4x1x16xf32> to vector<4x16xf32>
    %c0_63 = arith.constant 0 : index
    %c0_64 = arith.constant 0 : index
    %c11 = arith.constant 11 : index
    %c0_65 = arith.constant 0 : index
    %67 = vector.load %arg1[%c0_63, %c0_64, %c11, %c0_65] : memref<1x4x16x16xf32, #tpu.memory_space<vmem>>, vector<1x4x1x16xf32>
    %68 = vector.shape_cast %67 : vector<1x4x1x16xf32> to vector<4x16xf32>
    %69 = arith.addf %66, %68 : vector<4x16xf32>
    %c0_66 = arith.constant 0 : index
    %c0_67 = arith.constant 0 : index
    %70 = vector.load %arg2[%c0_66, %c0_67] : memref<16x8xf32, #tpu.memory_space<vmem>>, vector<16x8xf32>
    %cst_68 = arith.constant dense<0.000000e+00> : vector<4x8xf32>
    %71 = tpu.matmul %69, %70, %cst_68 {dimension_numbers = #tpu.dot_dimension_numbers<[1], [0], [0], [1], [0, 0, 1, 1], [], []>} : vector<4x16xf32>, vector<16x8xf32>, vector<4x8xf32> -> vector<4x8xf32>
    %c0_69 = arith.constant 0 : index
    %c40 = arith.constant 40 : index
    %72 = vector.load %arg17[%c0_69, %c40] : memref<4x64xf32, #tpu.memory_space<vmem>>, vector<4x8xf32>
    tpu.vector_store %arg17[%c0_69, %c40], %71 {strides = array<i32>} : memref<4x64xf32, #tpu.memory_space<vmem>>, vector<4x8xf32>,
    %c0_70 = arith.constant 0 : index
    %c0_71 = arith.constant 0 : index
    %c12 = arith.constant 12 : index
    %c0_72 = arith.constant 0 : index
    %73 = vector.load %arg1[%c0_70, %c0_71, %c12, %c0_72] : memref<1x4x16x16xf32, #tpu.memory_space<vmem>>, vector<1x4x1x16xf32>
    %74 = vector.shape_cast %73 : vector<1x4x1x16xf32> to vector<4x16xf32>
    %c0_73 = arith.constant 0 : index
    %c0_74 = arith.constant 0 : index
    %c13 = arith.constant 13 : index
    %c0_75 = arith.constant 0 : index
    %75 = vector.load %arg1[%c0_73, %c0_74, %c13, %c0_75] : memref<1x4x16x16xf32, #tpu.memory_space<vmem>>, vector<1x4x1x16xf32>
    %76 = vector.shape_cast %75 : vector<1x4x1x16xf32> to vector<4x16xf32>
    %77 = arith.addf %74, %76 : vector<4x16xf32>
    %c0_76 = arith.constant 0 : index
    %c0_77 = arith.constant 0 : index
    %78 = vector.load %arg2[%c0_76, %c0_77] : memref<16x8xf32, #tpu.memory_space<vmem>>, vector<16x8xf32>
    %cst_78 = arith.constant dense<0.000000e+00> : vector<4x8xf32>
    %79 = tpu.matmul %77, %78, %cst_78 {dimension_numbers = #tpu.dot_dimension_numbers<[1], [0], [0], [1], [0, 0, 1, 1], [], []>} : vector<4x16xf32>, vector<16x8xf32>, vector<4x8xf32> -> vector<4x8xf32>
    %c0_79 = arith.constant 0 : index
    %c48 = arith.constant 48 : index
    %80 = vector.load %arg17[%c0_79, %c48] : memref<4x64xf32, #tpu.memory_space<vmem>>, vector<4x8xf32>
    tpu.vector_store %arg17[%c0_79, %c48], %79 {strides = array<i32>} : memref<4x64xf32, #tpu.memory_space<vmem>>, vector<4x8xf32>,
    %c0_80 = arith.constant 0 : index
    %c0_81 = arith.constant 0 : index
    %c14 = arith.constant 14 : index
    %c0_82 = arith.constant 0 : index
    %81 = vector.load %arg1[%c0_80, %c0_81, %c14, %c0_82] : memref<1x4x16x16xf32, #tpu.memory_space<vmem>>, vector<1x4x1x16xf32>
    %82 = vector.shape_cast %81 : vector<1x4x1x16xf32> to vector<4x16xf32>
    %c0_83 = arith.constant 0 : index
    %c0_84 = arith.constant 0 : index
    %c15 = arith.constant 15 : index
    %c0_85 = arith.constant 0 : index
    %83 = vector.load %arg1[%c0_83, %c0_84, %c15, %c0_85] : memref<1x4x16x16xf32, #tpu.memory_space<vmem>>, vector<1x4x1x16xf32>
    %84 = vector.shape_cast %83 : vector<1x4x1x16xf32> to vector<4x16xf32>
    %85 = arith.addf %82, %84 : vector<4x16xf32>
    %c0_86 = arith.constant 0 : index
    %c0_87 = arith.constant 0 : index
    %86 = vector.load %arg2[%c0_86, %c0_87] : memref<16x8xf32, #tpu.memory_space<vmem>>, vector<16x8xf32>
    %cst_88 = arith.constant dense<0.000000e+00> : vector<4x8xf32>
    %87 = tpu.matmul %85, %86, %cst_88 {dimension_numbers = #tpu.dot_dimension_numbers<[1], [0], [0], [1], [0, 0, 1, 1], [], []>} : vector<4x16xf32>, vector<16x8xf32>, vector<4x8xf32> -> vector<4x8xf32>
    %c0_89 = arith.constant 0 : index
    %c56 = arith.constant 56 : index
    %88 = vector.load %arg17[%c0_89, %c56] : memref<4x64xf32, #tpu.memory_space<vmem>>, vector<4x8xf32>
    tpu.vector_store %arg17[%c0_89, %c56], %87 {strides = array<i32>} : memref<4x64xf32, #tpu.memory_space<vmem>>, vector<4x8xf32>,
    %c0_90 = arith.constant 0 : index
    %c0_91 = arith.constant 0 : index
    %89 = vector.load %arg17[%c0_90, %c0_91] : memref<4x64xf32, #tpu.memory_space<vmem>>, vector<4x64xf32>
    %c0_92 = arith.constant 0 : index
    %c0_93 = arith.constant 0 : index
    %90 = vector.load %arg3[%c0_92, %c0_93] : memref<8x4xbf16, #tpu.memory_space<vmem>>, vector<8x4xbf16>
    %91 = arith.truncf %89 : vector<4x64xf32> to vector<4x64xbf16>
    %cst_94 = arith.constant dense<0.000000e+00> : vector<8x64xf32>
    %92 = tpu.matmul %90, %91, %cst_94 {dimension_numbers = #tpu.dot_dimension_numbers<[1], [0], [0], [1], [0, 0, 1, 1], [], []>} : vector<8x4xbf16>, vector<4x64xbf16>, vector<8x64xf32> -> vector<8x64xf32>
    %c0_95 = arith.constant 0 : index
    %c0_96 = arith.constant 0 : index
    %93 = vector.load %arg4[%c0_95, %c0_96] : memref<8x1xf32, #tpu.memory_space<vmem>>, vector<8x1xf32>
    %94 = vector.broadcast %93 : vector<8x1xf32> to vector<8x64xf32>
    %95 = arith.addf %92, %94 : vector<8x64xf32>
    %96 = arith.truncf %95 : vector<8x64xf32> to vector<8x64xbf16>
    %c0_97 = arith.constant 0 : index
    %c16_98 = arith.constant 16 : index
    %97 = vector.load %arg16[%c0_97, %c16_98] : memref<8x96xbf16, #tpu.memory_space<vmem>>, vector<8x64xbf16>
    tpu.vector_store %arg16[%c0_97, %c16_98], %96 {strides = array<i32>} : memref<8x96xbf16, #tpu.memory_space<vmem>>, vector<8x64xbf16>,
    %c0_99 = arith.constant 0 : index
    %c7_100 = arith.constant 7 : index
    %98 = vector.load %arg16[%c0_99, %c7_100] : memref<8x96xbf16, #tpu.memory_space<vmem>>, vector<8x64xbf16>
    %cst_101 = arith.constant 0.000000e+00 : f32
    %99 = arith.truncf %cst_101 : f32 to bf16
    %100 = vector.shape_cast %18 : vector<1x64xi1> to vector<1x64xi1>
    %101 = vector.broadcast %100 : vector<1x64xi1> to vector<8x64xi1>
    %102 = vector.broadcast %99 : bf16 to vector<8x64xbf16>
    %103 = arith.select %101, %98, %102 : vector<8x64xi1>, vector<8x64xbf16>
    %c0_102 = arith.constant 0 : index
    %c0_103 = arith.constant 0 : index
    %c0_104 = arith.constant 0 : index
    %104 = vector.load %arg5[%c0_102, %c0_103, %c0_104] : memref<9x8x8xbf16, #tpu.memory_space<vmem>>, vector<1x8x8xbf16>
    %105 = vector.shape_cast %104 : vector<1x8x8xbf16> to vector<8x8xbf16>
    %cst_105 = arith.constant dense<0.000000e+00> : vector<8x64xf32>
    %106 = tpu.matmul %105, %103, %cst_105 {dimension_numbers = #tpu.dot_dimension_numbers<[1], [0], [0], [1], [0, 0, 1, 1], [], []>} : vector<8x8xbf16>, vector<8x64xbf16>, vector<8x64xf32> -> vector<8x64xf32>
    %c0_106 = arith.constant 0 : index
    %c8_107 = arith.constant 8 : index
    %107 = vector.load %arg16[%c0_106, %c8_107] : memref<8x96xbf16, #tpu.memory_space<vmem>>, vector<8x64xbf16>
    %c1_108 = arith.constant 1 : index
    %c0_109 = arith.constant 0 : index
    %c0_110 = arith.constant 0 : index
    %108 = vector.load %arg5[%c1_108, %c0_109, %c0_110] : memref<9x8x8xbf16, #tpu.memory_space<vmem>>, vector<1x8x8xbf16>
    %109 = vector.shape_cast %108 : vector<1x8x8xbf16> to vector<8x8xbf16>
    %cst_111 = arith.constant dense<0.000000e+00> : vector<8x64xf32>
    %110 = tpu.matmul %109, %107, %cst_111 {dimension_numbers = #tpu.dot_dimension_numbers<[1], [0], [0], [1], [0, 0, 1, 1], [], []>} : vector<8x8xbf16>, vector<8x64xbf16>, vector<8x64xf32> -> vector<8x64xf32>
    %111 = arith.addf %106, %110 : vector<8x64xf32>
    %c0_112 = arith.constant 0 : index
    %c9_113 = arith.constant 9 : index
    %112 = vector.load %arg16[%c0_112, %c9_113] : memref<8x96xbf16, #tpu.memory_space<vmem>>, vector<8x64xbf16>
    %cst_114 = arith.constant 0.000000e+00 : f32
    %113 = arith.truncf %cst_114 : f32 to bf16
    %114 = vector.shape_cast %20 : vector<1x64xi1> to vector<1x64xi1>
    %115 = vector.broadcast %114 : vector<1x64xi1> to vector<8x64xi1>
    %116 = vector.broadcast %113 : bf16 to vector<8x64xbf16>
    %117 = arith.select %115, %112, %116 : vector<8x64xi1>, vector<8x64xbf16>
    %c2_115 = arith.constant 2 : index
    %c0_116 = arith.constant 0 : index
    %c0_117 = arith.constant 0 : index
    %118 = vector.load %arg5[%c2_115, %c0_116, %c0_117] : memref<9x8x8xbf16, #tpu.memory_space<vmem>>, vector<1x8x8xbf16>
    %119 = vector.shape_cast %118 : vector<1x8x8xbf16> to vector<8x8xbf16>
    %cst_118 = arith.constant dense<0.000000e+00> : vector<8x64xf32>
    %120 = tpu.matmul %119, %117, %cst_118 {dimension_numbers = #tpu.dot_dimension_numbers<[1], [0], [0], [1], [0, 0, 1, 1], [], []>} : vector<8x8xbf16>, vector<8x64xbf16>, vector<8x64xf32> -> vector<8x64xf32>
    %121 = arith.addf %111, %120 : vector<8x64xf32>
    %c0_119 = arith.constant 0 : index
    %c15_120 = arith.constant 15 : index
    %122 = vector.load %arg16[%c0_119, %c15_120] : memref<8x96xbf16, #tpu.memory_space<vmem>>, vector<8x64xbf16>
    %cst_121 = arith.constant 0.000000e+00 : f32
    %123 = arith.truncf %cst_121 : f32 to bf16
    %124 = vector.shape_cast %18 : vector<1x64xi1> to vector<1x64xi1>
    %125 = vector.broadcast %124 : vector<1x64xi1> to vector<8x64xi1>
    %126 = vector.broadcast %123 : bf16 to vector<8x64xbf16>
    %127 = arith.select %125, %122, %126 : vector<8x64xi1>, vector<8x64xbf16>
    %c3_122 = arith.constant 3 : index
    %c0_123 = arith.constant 0 : index
    %c0_124 = arith.constant 0 : index
    %128 = vector.load %arg5[%c3_122, %c0_123, %c0_124] : memref<9x8x8xbf16, #tpu.memory_space<vmem>>, vector<1x8x8xbf16>
    %129 = vector.shape_cast %128 : vector<1x8x8xbf16> to vector<8x8xbf16>
    %cst_125 = arith.constant dense<0.000000e+00> : vector<8x64xf32>
    %130 = tpu.matmul %129, %127, %cst_125 {dimension_numbers = #tpu.dot_dimension_numbers<[1], [0], [0], [1], [0, 0, 1, 1], [], []>} : vector<8x8xbf16>, vector<8x64xbf16>, vector<8x64xf32> -> vector<8x64xf32>
    %131 = arith.addf %121, %130 : vector<8x64xf32>
    %c0_126 = arith.constant 0 : index
    %c16_127 = arith.constant 16 : index
    %132 = vector.load %arg16[%c0_126, %c16_127] : memref<8x96xbf16, #tpu.memory_space<vmem>>, vector<8x64xbf16>
    %c4_128 = arith.constant 4 : index
    %c0_129 = arith.constant 0 : index
    %c0_130 = arith.constant 0 : index
    %133 = vector.load %arg5[%c4_128, %c0_129, %c0_130] : memref<9x8x8xbf16, #tpu.memory_space<vmem>>, vector<1x8x8xbf16>
    %134 = vector.shape_cast %133 : vector<1x8x8xbf16> to vector<8x8xbf16>
    %cst_131 = arith.constant dense<0.000000e+00> : vector<8x64xf32>
    %135 = tpu.matmul %134, %132, %cst_131 {dimension_numbers = #tpu.dot_dimension_numbers<[1], [0], [0], [1], [0, 0, 1, 1], [], []>} : vector<8x8xbf16>, vector<8x64xbf16>, vector<8x64xf32> -> vector<8x64xf32>
    %136 = arith.addf %131, %135 : vector<8x64xf32>
    %c0_132 = arith.constant 0 : index
    %c17 = arith.constant 17 : index
    %137 = vector.load %arg16[%c0_132, %c17] : memref<8x96xbf16, #tpu.memory_space<vmem>>, vector<8x64xbf16>
    %cst_133 = arith.constant 0.000000e+00 : f32
    %138 = arith.truncf %cst_133 : f32 to bf16
    %139 = vector.shape_cast %20 : vector<1x64xi1> to vector<1x64xi1>
    %140 = vector.broadcast %139 : vector<1x64xi1> to vector<8x64xi1>
    %141 = vector.broadcast %138 : bf16 to vector<8x64xbf16>
    %142 = arith.select %140, %137, %141 : vector<8x64xi1>, vector<8x64xbf16>
    %c5_134 = arith.constant 5 : index
    %c0_135 = arith.constant 0 : index
    %c0_136 = arith.constant 0 : index
    %143 = vector.load %arg5[%c5_134, %c0_135, %c0_136] : memref<9x8x8xbf16, #tpu.memory_space<vmem>>, vector<1x8x8xbf16>
    %144 = vector.shape_cast %143 : vector<1x8x8xbf16> to vector<8x8xbf16>
    %cst_137 = arith.constant dense<0.000000e+00> : vector<8x64xf32>
    %145 = tpu.matmul %144, %142, %cst_137 {dimension_numbers = #tpu.dot_dimension_numbers<[1], [0], [0], [1], [0, 0, 1, 1], [], []>} : vector<8x8xbf16>, vector<8x64xbf16>, vector<8x64xf32> -> vector<8x64xf32>
    %146 = arith.addf %136, %145 : vector<8x64xf32>
    %c0_138 = arith.constant 0 : index
    %c23 = arith.constant 23 : index
    %147 = vector.load %arg16[%c0_138, %c23] : memref<8x96xbf16, #tpu.memory_space<vmem>>, vector<8x64xbf16>
    %cst_139 = arith.constant 0.000000e+00 : f32
    %148 = arith.truncf %cst_139 : f32 to bf16
    %149 = vector.shape_cast %18 : vector<1x64xi1> to vector<1x64xi1>
    %150 = vector.broadcast %149 : vector<1x64xi1> to vector<8x64xi1>
    %151 = vector.broadcast %148 : bf16 to vector<8x64xbf16>
    %152 = arith.select %150, %147, %151 : vector<8x64xi1>, vector<8x64xbf16>
    %c6_140 = arith.constant 6 : index
    %c0_141 = arith.constant 0 : index
    %c0_142 = arith.constant 0 : index
    %153 = vector.load %arg5[%c6_140, %c0_141, %c0_142] : memref<9x8x8xbf16, #tpu.memory_space<vmem>>, vector<1x8x8xbf16>
    %154 = vector.shape_cast %153 : vector<1x8x8xbf16> to vector<8x8xbf16>
    %cst_143 = arith.constant dense<0.000000e+00> : vector<8x64xf32>
    %155 = tpu.matmul %154, %152, %cst_143 {dimension_numbers = #tpu.dot_dimension_numbers<[1], [0], [0], [1], [0, 0, 1, 1], [], []>} : vector<8x8xbf16>, vector<8x64xbf16>, vector<8x64xf32> -> vector<8x64xf32>
    %156 = arith.addf %146, %155 : vector<8x64xf32>
    %c0_144 = arith.constant 0 : index
    %c24_145 = arith.constant 24 : index
    %157 = vector.load %arg16[%c0_144, %c24_145] : memref<8x96xbf16, #tpu.memory_space<vmem>>, vector<8x64xbf16>
    %c7_146 = arith.constant 7 : index
    %c0_147 = arith.constant 0 : index
    %c0_148 = arith.constant 0 : index
    %158 = vector.load %arg5[%c7_146, %c0_147, %c0_148] : memref<9x8x8xbf16, #tpu.memory_space<vmem>>, vector<1x8x8xbf16>
    %159 = vector.shape_cast %158 : vector<1x8x8xbf16> to vector<8x8xbf16>
    %cst_149 = arith.constant dense<0.000000e+00> : vector<8x64xf32>
    %160 = tpu.matmul %159, %157, %cst_149 {dimension_numbers = #tpu.dot_dimension_numbers<[1], [0], [0], [1], [0, 0, 1, 1], [], []>} : vector<8x8xbf16>, vector<8x64xbf16>, vector<8x64xf32> -> vector<8x64xf32>
    %161 = arith.addf %156, %160 : vector<8x64xf32>
    %c0_150 = arith.constant 0 : index
    %c25 = arith.constant 25 : index
    %162 = vector.load %arg16[%c0_150, %c25] : memref<8x96xbf16, #tpu.memory_space<vmem>>, vector<8x64xbf16>
    %cst_151 = arith.constant 0.000000e+00 : f32
    %163 = arith.truncf %cst_151 : f32 to bf16
    %164 = vector.shape_cast %20 : vector<1x64xi1> to vector<1x64xi1>
    %165 = vector.broadcast %164 : vector<1x64xi1> to vector<8x64xi1>
    %166 = vector.broadcast %163 : bf16 to vector<8x64xbf16>
    %167 = arith.select %165, %162, %166 : vector<8x64xi1>, vector<8x64xbf16>
    %c8_152 = arith.constant 8 : index
    %c0_153 = arith.constant 0 : index
    %c0_154 = arith.constant 0 : index
    %168 = vector.load %arg5[%c8_152, %c0_153, %c0_154] : memref<9x8x8xbf16, #tpu.memory_space<vmem>>, vector<1x8x8xbf16>
    %169 = vector.shape_cast %168 : vector<1x8x8xbf16> to vector<8x8xbf16>
    %cst_155 = arith.constant dense<0.000000e+00> : vector<8x64xf32>
    %170 = tpu.matmul %169, %167, %cst_155 {dimension_numbers = #tpu.dot_dimension_numbers<[1], [0], [0], [1], [0, 0, 1, 1], [], []>} : vector<8x8xbf16>, vector<8x64xbf16>, vector<8x64xf32> -> vector<8x64xf32>
    %171 = arith.addf %161, %170 : vector<8x64xf32>
    %c0_156 = arith.constant 0 : index
    %c0_157 = arith.constant 0 : index
    %172 = vector.load %arg6[%c0_156, %c0_157] : memref<8x1xf32, #tpu.memory_space<vmem>>, vector<8x1xf32>
    %173 = vector.broadcast %172 : vector<8x1xf32> to vector<8x64xf32>
    %174 = arith.addf %171, %173 : vector<8x64xf32>
    %cst_158 = arith.constant 0.000000e+00 : f32
    %175 = vector.broadcast %cst_158 : f32 to vector<8x64xf32>
    %176 = arith.maximumf %174, %175 : vector<8x64xf32>
    %177 = arith.truncf %176 : vector<8x64xf32> to vector<8x64xbf16>
    %c0_159 = arith.constant 0 : index
    %c16_160 = arith.constant 16 : index
    %178 = vector.load %arg16[%c0_159, %c16_160] : memref<8x96xbf16, #tpu.memory_space<vmem>>, vector<8x64xbf16>
    tpu.vector_store %arg16[%c0_159, %c16_160], %177 {strides = array<i32>} : memref<8x96xbf16, #tpu.memory_space<vmem>>, vector<8x64xbf16>,
    %c0_161 = arith.constant 0 : index
    %c7_162 = arith.constant 7 : index
    %179 = vector.load %arg16[%c0_161, %c7_162] : memref<8x96xbf16, #tpu.memory_space<vmem>>, vector<8x64xbf16>
    %cst_163 = arith.constant 0.000000e+00 : f32
    %180 = arith.truncf %cst_163 : f32 to bf16
    %181 = vector.shape_cast %18 : vector<1x64xi1> to vector<1x64xi1>
    %182 = vector.broadcast %181 : vector<1x64xi1> to vector<8x64xi1>
    %183 = vector.broadcast %180 : bf16 to vector<8x64xbf16>
    %184 = arith.select %182, %179, %183 : vector<8x64xi1>, vector<8x64xbf16>
    %c0_164 = arith.constant 0 : index
    %c0_165 = arith.constant 0 : index
    %c0_166 = arith.constant 0 : index
    %185 = vector.load %arg7[%c0_164, %c0_165, %c0_166] : memref<9x8x8xbf16, #tpu.memory_space<vmem>>, vector<1x8x8xbf16>
    %186 = vector.shape_cast %185 : vector<1x8x8xbf16> to vector<8x8xbf16>
    %cst_167 = arith.constant dense<0.000000e+00> : vector<8x64xf32>
    %187 = tpu.matmul %186, %184, %cst_167 {dimension_numbers = #tpu.dot_dimension_numbers<[1], [0], [0], [1], [0, 0, 1, 1], [], []>} : vector<8x8xbf16>, vector<8x64xbf16>, vector<8x64xf32> -> vector<8x64xf32>
    %c0_168 = arith.constant 0 : index
    %c8_169 = arith.constant 8 : index
    %188 = vector.load %arg16[%c0_168, %c8_169] : memref<8x96xbf16, #tpu.memory_space<vmem>>, vector<8x64xbf16>
    %c1_170 = arith.constant 1 : index
    %c0_171 = arith.constant 0 : index
    %c0_172 = arith.constant 0 : index
    %189 = vector.load %arg7[%c1_170, %c0_171, %c0_172] : memref<9x8x8xbf16, #tpu.memory_space<vmem>>, vector<1x8x8xbf16>
    %190 = vector.shape_cast %189 : vector<1x8x8xbf16> to vector<8x8xbf16>
    %cst_173 = arith.constant dense<0.000000e+00> : vector<8x64xf32>
    %191 = tpu.matmul %190, %188, %cst_173 {dimension_numbers = #tpu.dot_dimension_numbers<[1], [0], [0], [1], [0, 0, 1, 1], [], []>} : vector<8x8xbf16>, vector<8x64xbf16>, vector<8x64xf32> -> vector<8x64xf32>
    %192 = arith.addf %187, %191 : vector<8x64xf32>
    %c0_174 = arith.constant 0 : index
    %c9_175 = arith.constant 9 : index
    %193 = vector.load %arg16[%c0_174, %c9_175] : memref<8x96xbf16, #tpu.memory_space<vmem>>, vector<8x64xbf16>
    %cst_176 = arith.constant 0.000000e+00 : f32
    %194 = arith.truncf %cst_176 : f32 to bf16
    %195 = vector.shape_cast %20 : vector<1x64xi1> to vector<1x64xi1>
    %196 = vector.broadcast %195 : vector<1x64xi1> to vector<8x64xi1>
    %197 = vector.broadcast %194 : bf16 to vector<8x64xbf16>
    %198 = arith.select %196, %193, %197 : vector<8x64xi1>, vector<8x64xbf16>
    %c2_177 = arith.constant 2 : index
    %c0_178 = arith.constant 0 : index
    %c0_179 = arith.constant 0 : index
    %199 = vector.load %arg7[%c2_177, %c0_178, %c0_179] : memref<9x8x8xbf16, #tpu.memory_space<vmem>>, vector<1x8x8xbf16>
    %200 = vector.shape_cast %199 : vector<1x8x8xbf16> to vector<8x8xbf16>
    %cst_180 = arith.constant dense<0.000000e+00> : vector<8x64xf32>
    %201 = tpu.matmul %200, %198, %cst_180 {dimension_numbers = #tpu.dot_dimension_numbers<[1], [0], [0], [1], [0, 0, 1, 1], [], []>} : vector<8x8xbf16>, vector<8x64xbf16>, vector<8x64xf32> -> vector<8x64xf32>
    %202 = arith.addf %192, %201 : vector<8x64xf32>
    %c0_181 = arith.constant 0 : index
    %c15_182 = arith.constant 15 : index
    %203 = vector.load %arg16[%c0_181, %c15_182] : memref<8x96xbf16, #tpu.memory_space<vmem>>, vector<8x64xbf16>
    %cst_183 = arith.constant 0.000000e+00 : f32
    %204 = arith.truncf %cst_183 : f32 to bf16
    %205 = vector.shape_cast %18 : vector<1x64xi1> to vector<1x64xi1>
    %206 = vector.broadcast %205 : vector<1x64xi1> to vector<8x64xi1>
    %207 = vector.broadcast %204 : bf16 to vector<8x64xbf16>
    %208 = arith.select %206, %203, %207 : vector<8x64xi1>, vector<8x64xbf16>
    %c3_184 = arith.constant 3 : index
    %c0_185 = arith.constant 0 : index
    %c0_186 = arith.constant 0 : index
    %209 = vector.load %arg7[%c3_184, %c0_185, %c0_186] : memref<9x8x8xbf16, #tpu.memory_space<vmem>>, vector<1x8x8xbf16>
    %210 = vector.shape_cast %209 : vector<1x8x8xbf16> to vector<8x8xbf16>
    %cst_187 = arith.constant dense<0.000000e+00> : vector<8x64xf32>
    %211 = tpu.matmul %210, %208, %cst_187 {dimension_numbers = #tpu.dot_dimension_numbers<[1], [0], [0], [1], [0, 0, 1, 1], [], []>} : vector<8x8xbf16>, vector<8x64xbf16>, vector<8x64xf32> -> vector<8x64xf32>
    %212 = arith.addf %202, %211 : vector<8x64xf32>
    %c0_188 = arith.constant 0 : index
    %c16_189 = arith.constant 16 : index
    %213 = vector.load %arg16[%c0_188, %c16_189] : memref<8x96xbf16, #tpu.memory_space<vmem>>, vector<8x64xbf16>
    %c4_190 = arith.constant 4 : index
    %c0_191 = arith.constant 0 : index
    %c0_192 = arith.constant 0 : index
    %214 = vector.load %arg7[%c4_190, %c0_191, %c0_192] : memref<9x8x8xbf16, #tpu.memory_space<vmem>>, vector<1x8x8xbf16>
    %215 = vector.shape_cast %214 : vector<1x8x8xbf16> to vector<8x8xbf16>
    %cst_193 = arith.constant dense<0.000000e+00> : vector<8x64xf32>
    %216 = tpu.matmul %215, %213, %cst_193 {dimension_numbers = #tpu.dot_dimension_numbers<[1], [0], [0], [1], [0, 0, 1, 1], [], []>} : vector<8x8xbf16>, vector<8x64xbf16>, vector<8x64xf32> -> vector<8x64xf32>
    %217 = arith.addf %212, %216 : vector<8x64xf32>
    %c0_194 = arith.constant 0 : index
    %c17_195 = arith.constant 17 : index
    %218 = vector.load %arg16[%c0_194, %c17_195] : memref<8x96xbf16, #tpu.memory_space<vmem>>, vector<8x64xbf16>
    %cst_196 = arith.constant 0.000000e+00 : f32
    %219 = arith.truncf %cst_196 : f32 to bf16
    %220 = vector.shape_cast %20 : vector<1x64xi1> to vector<1x64xi1>
    %221 = vector.broadcast %220 : vector<1x64xi1> to vector<8x64xi1>
    %222 = vector.broadcast %219 : bf16 to vector<8x64xbf16>
    %223 = arith.select %221, %218, %222 : vector<8x64xi1>, vector<8x64xbf16>
    %c5_197 = arith.constant 5 : index
    %c0_198 = arith.constant 0 : index
    %c0_199 = arith.constant 0 : index
    %224 = vector.load %arg7[%c5_197, %c0_198, %c0_199] : memref<9x8x8xbf16, #tpu.memory_space<vmem>>, vector<1x8x8xbf16>
    %225 = vector.shape_cast %224 : vector<1x8x8xbf16> to vector<8x8xbf16>
    %cst_200 = arith.constant dense<0.000000e+00> : vector<8x64xf32>
    %226 = tpu.matmul %225, %223, %cst_200 {dimension_numbers = #tpu.dot_dimension_numbers<[1], [0], [0], [1], [0, 0, 1, 1], [], []>} : vector<8x8xbf16>, vector<8x64xbf16>, vector<8x64xf32> -> vector<8x64xf32>
    %227 = arith.addf %217, %226 : vector<8x64xf32>
    %c0_201 = arith.constant 0 : index
    %c23_202 = arith.constant 23 : index
    %228 = vector.load %arg16[%c0_201, %c23_202] : memref<8x96xbf16, #tpu.memory_space<vmem>>, vector<8x64xbf16>
    %cst_203 = arith.constant 0.000000e+00 : f32
    %229 = arith.truncf %cst_203 : f32 to bf16
    %230 = vector.shape_cast %18 : vector<1x64xi1> to vector<1x64xi1>
    %231 = vector.broadcast %230 : vector<1x64xi1> to vector<8x64xi1>
    %232 = vector.broadcast %229 : bf16 to vector<8x64xbf16>
    %233 = arith.select %231, %228, %232 : vector<8x64xi1>, vector<8x64xbf16>
    %c6_204 = arith.constant 6 : index
    %c0_205 = arith.constant 0 : index
    %c0_206 = arith.constant 0 : index
    %234 = vector.load %arg7[%c6_204, %c0_205, %c0_206] : memref<9x8x8xbf16, #tpu.memory_space<vmem>>, vector<1x8x8xbf16>
    %235 = vector.shape_cast %234 : vector<1x8x8xbf16> to vector<8x8xbf16>
    %cst_207 = arith.constant dense<0.000000e+00> : vector<8x64xf32>
    %236 = tpu.matmul %235, %233, %cst_207 {dimension_numbers = #tpu.dot_dimension_numbers<[1], [0], [0], [1], [0, 0, 1, 1], [], []>} : vector<8x8xbf16>, vector<8x64xbf16>, vector<8x64xf32> -> vector<8x64xf32>
    %237 = arith.addf %227, %236 : vector<8x64xf32>
    %c0_208 = arith.constant 0 : index
    %c24_209 = arith.constant 24 : index
    %238 = vector.load %arg16[%c0_208, %c24_209] : memref<8x96xbf16, #tpu.memory_space<vmem>>, vector<8x64xbf16>
    %c7_210 = arith.constant 7 : index
    %c0_211 = arith.constant 0 : index
    %c0_212 = arith.constant 0 : index
    %239 = vector.load %arg7[%c7_210, %c0_211, %c0_212] : memref<9x8x8xbf16, #tpu.memory_space<vmem>>, vector<1x8x8xbf16>
    %240 = vector.shape_cast %239 : vector<1x8x8xbf16> to vector<8x8xbf16>
    %cst_213 = arith.constant dense<0.000000e+00> : vector<8x64xf32>
    %241 = tpu.matmul %240, %238, %cst_213 {dimension_numbers = #tpu.dot_dimension_numbers<[1], [0], [0], [1], [0, 0, 1, 1], [], []>} : vector<8x8xbf16>, vector<8x64xbf16>, vector<8x64xf32> -> vector<8x64xf32>
    %242 = arith.addf %237, %241 : vector<8x64xf32>
    %c0_214 = arith.constant 0 : index
    %c25_215 = arith.constant 25 : index
    %243 = vector.load %arg16[%c0_214, %c25_215] : memref<8x96xbf16, #tpu.memory_space<vmem>>, vector<8x64xbf16>
    %cst_216 = arith.constant 0.000000e+00 : f32
    %244 = arith.truncf %cst_216 : f32 to bf16
    %245 = vector.shape_cast %20 : vector<1x64xi1> to vector<1x64xi1>
    %246 = vector.broadcast %245 : vector<1x64xi1> to vector<8x64xi1>
    %247 = vector.broadcast %244 : bf16 to vector<8x64xbf16>
    %248 = arith.select %246, %243, %247 : vector<8x64xi1>, vector<8x64xbf16>
    %c8_217 = arith.constant 8 : index
    %c0_218 = arith.constant 0 : index
    %c0_219 = arith.constant 0 : index
    %249 = vector.load %arg7[%c8_217, %c0_218, %c0_219] : memref<9x8x8xbf16, #tpu.memory_space<vmem>>, vector<1x8x8xbf16>
    %250 = vector.shape_cast %249 : vector<1x8x8xbf16> to vector<8x8xbf16>
    %cst_220 = arith.constant dense<0.000000e+00> : vector<8x64xf32>
    %251 = tpu.matmul %250, %248, %cst_220 {dimension_numbers = #tpu.dot_dimension_numbers<[1], [0], [0], [1], [0, 0, 1, 1], [], []>} : vector<8x8xbf16>, vector<8x64xbf16>, vector<8x64xf32> -> vector<8x64xf32>
    %252 = arith.addf %242, %251 : vector<8x64xf32>
    %c0_221 = arith.constant 0 : index
    %c0_222 = arith.constant 0 : index
    %253 = vector.load %arg8[%c0_221, %c0_222] : memref<8x1xf32, #tpu.memory_space<vmem>>, vector<8x1xf32>
    %254 = vector.broadcast %253 : vector<8x1xf32> to vector<8x64xf32>
    %255 = arith.addf %252, %254 : vector<8x64xf32>
    %256 = arith.addf %95, %255 : vector<8x64xf32>
    %257 = arith.truncf %256 : vector<8x64xf32> to vector<8x64xbf16>
    %c0_223 = arith.constant 0 : index
    %c16_224 = arith.constant 16 : index
    %258 = vector.load %arg16[%c0_223, %c16_224] : memref<8x96xbf16, #tpu.memory_space<vmem>>, vector<8x64xbf16>
    tpu.vector_store %arg16[%c0_223, %c16_224], %257 {strides = array<i32>} : memref<8x96xbf16, #tpu.memory_space<vmem>>, vector<8x64xbf16>,
    %c0_225 = arith.constant 0 : index
    %c7_226 = arith.constant 7 : index
    %259 = vector.load %arg16[%c0_225, %c7_226] : memref<8x96xbf16, #tpu.memory_space<vmem>>, vector<8x64xbf16>
    %cst_227 = arith.constant 0.000000e+00 : f32
    %260 = arith.truncf %cst_227 : f32 to bf16
    %261 = vector.shape_cast %18 : vector<1x64xi1> to vector<1x64xi1>
    %262 = vector.broadcast %261 : vector<1x64xi1> to vector<8x64xi1>
    %263 = vector.broadcast %260 : bf16 to vector<8x64xbf16>
    %264 = arith.select %262, %259, %263 : vector<8x64xi1>, vector<8x64xbf16>
    %c0_228 = arith.constant 0 : index
    %c0_229 = arith.constant 0 : index
    %c0_230 = arith.constant 0 : index
    %265 = vector.load %arg9[%c0_228, %c0_229, %c0_230] : memref<9x8x8xbf16, #tpu.memory_space<vmem>>, vector<1x8x8xbf16>
    %266 = vector.shape_cast %265 : vector<1x8x8xbf16> to vector<8x8xbf16>
    %cst_231 = arith.constant dense<0.000000e+00> : vector<8x64xf32>
    %267 = tpu.matmul %266, %264, %cst_231 {dimension_numbers = #tpu.dot_dimension_numbers<[1], [0], [0], [1], [0, 0, 1, 1], [], []>} : vector<8x8xbf16>, vector<8x64xbf16>, vector<8x64xf32> -> vector<8x64xf32>
    %c0_232 = arith.constant 0 : index
    %c8_233 = arith.constant 8 : index
    %268 = vector.load %arg16[%c0_232, %c8_233] : memref<8x96xbf16, #tpu.memory_space<vmem>>, vector<8x64xbf16>
    %c1_234 = arith.constant 1 : index
    %c0_235 = arith.constant 0 : index
    %c0_236 = arith.constant 0 : index
    %269 = vector.load %arg9[%c1_234, %c0_235, %c0_236] : memref<9x8x8xbf16, #tpu.memory_space<vmem>>, vector<1x8x8xbf16>
    %270 = vector.shape_cast %269 : vector<1x8x8xbf16> to vector<8x8xbf16>
    %cst_237 = arith.constant dense<0.000000e+00> : vector<8x64xf32>
    %271 = tpu.matmul %270, %268, %cst_237 {dimension_numbers = #tpu.dot_dimension_numbers<[1], [0], [0], [1], [0, 0, 1, 1], [], []>} : vector<8x8xbf16>, vector<8x64xbf16>, vector<8x64xf32> -> vector<8x64xf32>
    %272 = arith.addf %267, %271 : vector<8x64xf32>
    %c0_238 = arith.constant 0 : index
    %c9_239 = arith.constant 9 : index
    %273 = vector.load %arg16[%c0_238, %c9_239] : memref<8x96xbf16, #tpu.memory_space<vmem>>, vector<8x64xbf16>
    %cst_240 = arith.constant 0.000000e+00 : f32
    %274 = arith.truncf %cst_240 : f32 to bf16
    %275 = vector.shape_cast %20 : vector<1x64xi1> to vector<1x64xi1>
    %276 = vector.broadcast %275 : vector<1x64xi1> to vector<8x64xi1>
    %277 = vector.broadcast %274 : bf16 to vector<8x64xbf16>
    %278 = arith.select %276, %273, %277 : vector<8x64xi1>, vector<8x64xbf16>
    %c2_241 = arith.constant 2 : index
    %c0_242 = arith.constant 0 : index
    %c0_243 = arith.constant 0 : index
    %279 = vector.load %arg9[%c2_241, %c0_242, %c0_243] : memref<9x8x8xbf16, #tpu.memory_space<vmem>>, vector<1x8x8xbf16>
    %280 = vector.shape_cast %279 : vector<1x8x8xbf16> to vector<8x8xbf16>
    %cst_244 = arith.constant dense<0.000000e+00> : vector<8x64xf32>
    %281 = tpu.matmul %280, %278, %cst_244 {dimension_numbers = #tpu.dot_dimension_numbers<[1], [0], [0], [1], [0, 0, 1, 1], [], []>} : vector<8x8xbf16>, vector<8x64xbf16>, vector<8x64xf32> -> vector<8x64xf32>
    %282 = arith.addf %272, %281 : vector<8x64xf32>
    %c0_245 = arith.constant 0 : index
    %c15_246 = arith.constant 15 : index
    %283 = vector.load %arg16[%c0_245, %c15_246] : memref<8x96xbf16, #tpu.memory_space<vmem>>, vector<8x64xbf16>
    %cst_247 = arith.constant 0.000000e+00 : f32
    %284 = arith.truncf %cst_247 : f32 to bf16
    %285 = vector.shape_cast %18 : vector<1x64xi1> to vector<1x64xi1>
    %286 = vector.broadcast %285 : vector<1x64xi1> to vector<8x64xi1>
    %287 = vector.broadcast %284 : bf16 to vector<8x64xbf16>
    %288 = arith.select %286, %283, %287 : vector<8x64xi1>, vector<8x64xbf16>
    %c3_248 = arith.constant 3 : index
    %c0_249 = arith.constant 0 : index
    %c0_250 = arith.constant 0 : index
    %289 = vector.load %arg9[%c3_248, %c0_249, %c0_250] : memref<9x8x8xbf16, #tpu.memory_space<vmem>>, vector<1x8x8xbf16>
    %290 = vector.shape_cast %289 : vector<1x8x8xbf16> to vector<8x8xbf16>
    %cst_251 = arith.constant dense<0.000000e+00> : vector<8x64xf32>
    %291 = tpu.matmul %290, %288, %cst_251 {dimension_numbers = #tpu.dot_dimension_numbers<[1], [0], [0], [1], [0, 0, 1, 1], [], []>} : vector<8x8xbf16>, vector<8x64xbf16>, vector<8x64xf32> -> vector<8x64xf32>
    %292 = arith.addf %282, %291 : vector<8x64xf32>
    %c0_252 = arith.constant 0 : index
    %c16_253 = arith.constant 16 : index
    %293 = vector.load %arg16[%c0_252, %c16_253] : memref<8x96xbf16, #tpu.memory_space<vmem>>, vector<8x64xbf16>
    %c4_254 = arith.constant 4 : index
    %c0_255 = arith.constant 0 : index
    %c0_256 = arith.constant 0 : index
    %294 = vector.load %arg9[%c4_254, %c0_255, %c0_256] : memref<9x8x8xbf16, #tpu.memory_space<vmem>>, vector<1x8x8xbf16>
    %295 = vector.shape_cast %294 : vector<1x8x8xbf16> to vector<8x8xbf16>
    %cst_257 = arith.constant dense<0.000000e+00> : vector<8x64xf32>
    %296 = tpu.matmul %295, %293, %cst_257 {dimension_numbers = #tpu.dot_dimension_numbers<[1], [0], [0], [1], [0, 0, 1, 1], [], []>} : vector<8x8xbf16>, vector<8x64xbf16>, vector<8x64xf32> -> vector<8x64xf32>
    %297 = arith.addf %292, %296 : vector<8x64xf32>
    %c0_258 = arith.constant 0 : index
    %c17_259 = arith.constant 17 : index
    %298 = vector.load %arg16[%c0_258, %c17_259] : memref<8x96xbf16, #tpu.memory_space<vmem>>, vector<8x64xbf16>
    %cst_260 = arith.constant 0.000000e+00 : f32
    %299 = arith.truncf %cst_260 : f32 to bf16
    %300 = vector.shape_cast %20 : vector<1x64xi1> to vector<1x64xi1>
    %301 = vector.broadcast %300 : vector<1x64xi1> to vector<8x64xi1>
    %302 = vector.broadcast %299 : bf16 to vector<8x64xbf16>
    %303 = arith.select %301, %298, %302 : vector<8x64xi1>, vector<8x64xbf16>
    %c5_261 = arith.constant 5 : index
    %c0_262 = arith.constant 0 : index
    %c0_263 = arith.constant 0 : index
    %304 = vector.load %arg9[%c5_261, %c0_262, %c0_263] : memref<9x8x8xbf16, #tpu.memory_space<vmem>>, vector<1x8x8xbf16>
    %305 = vector.shape_cast %304 : vector<1x8x8xbf16> to vector<8x8xbf16>
    %cst_264 = arith.constant dense<0.000000e+00> : vector<8x64xf32>
    %306 = tpu.matmul %305, %303, %cst_264 {dimension_numbers = #tpu.dot_dimension_numbers<[1], [0], [0], [1], [0, 0, 1, 1], [], []>} : vector<8x8xbf16>, vector<8x64xbf16>, vector<8x64xf32> -> vector<8x64xf32>
    %307 = arith.addf %297, %306 : vector<8x64xf32>
    %c0_265 = arith.constant 0 : index
    %c23_266 = arith.constant 23 : index
    %308 = vector.load %arg16[%c0_265, %c23_266] : memref<8x96xbf16, #tpu.memory_space<vmem>>, vector<8x64xbf16>
    %cst_267 = arith.constant 0.000000e+00 : f32
    %309 = arith.truncf %cst_267 : f32 to bf16
    %310 = vector.shape_cast %18 : vector<1x64xi1> to vector<1x64xi1>
    %311 = vector.broadcast %310 : vector<1x64xi1> to vector<8x64xi1>
    %312 = vector.broadcast %309 : bf16 to vector<8x64xbf16>
    %313 = arith.select %311, %308, %312 : vector<8x64xi1>, vector<8x64xbf16>
    %c6_268 = arith.constant 6 : index
    %c0_269 = arith.constant 0 : index
    %c0_270 = arith.constant 0 : index
    %314 = vector.load %arg9[%c6_268, %c0_269, %c0_270] : memref<9x8x8xbf16, #tpu.memory_space<vmem>>, vector<1x8x8xbf16>
    %315 = vector.shape_cast %314 : vector<1x8x8xbf16> to vector<8x8xbf16>
    %cst_271 = arith.constant dense<0.000000e+00> : vector<8x64xf32>
    %316 = tpu.matmul %315, %313, %cst_271 {dimension_numbers = #tpu.dot_dimension_numbers<[1], [0], [0], [1], [0, 0, 1, 1], [], []>} : vector<8x8xbf16>, vector<8x64xbf16>, vector<8x64xf32> -> vector<8x64xf32>
    %317 = arith.addf %307, %316 : vector<8x64xf32>
    %c0_272 = arith.constant 0 : index
    %c24_273 = arith.constant 24 : index
    %318 = vector.load %arg16[%c0_272, %c24_273] : memref<8x96xbf16, #tpu.memory_space<vmem>>, vector<8x64xbf16>
    %c7_274 = arith.constant 7 : index
    %c0_275 = arith.constant 0 : index
    %c0_276 = arith.constant 0 : index
    %319 = vector.load %arg9[%c7_274, %c0_275, %c0_276] : memref<9x8x8xbf16, #tpu.memory_space<vmem>>, vector<1x8x8xbf16>
    %320 = vector.shape_cast %319 : vector<1x8x8xbf16> to vector<8x8xbf16>
    %cst_277 = arith.constant dense<0.000000e+00> : vector<8x64xf32>
    %321 = tpu.matmul %320, %318, %cst_277 {dimension_numbers = #tpu.dot_dimension_numbers<[1], [0], [0], [1], [0, 0, 1, 1], [], []>} : vector<8x8xbf16>, vector<8x64xbf16>, vector<8x64xf32> -> vector<8x64xf32>
    %322 = arith.addf %317, %321 : vector<8x64xf32>
    %c0_278 = arith.constant 0 : index
    %c25_279 = arith.constant 25 : index
    %323 = vector.load %arg16[%c0_278, %c25_279] : memref<8x96xbf16, #tpu.memory_space<vmem>>, vector<8x64xbf16>
    %cst_280 = arith.constant 0.000000e+00 : f32
    %324 = arith.truncf %cst_280 : f32 to bf16
    %325 = vector.shape_cast %20 : vector<1x64xi1> to vector<1x64xi1>
    %326 = vector.broadcast %325 : vector<1x64xi1> to vector<8x64xi1>
    %327 = vector.broadcast %324 : bf16 to vector<8x64xbf16>
    %328 = arith.select %326, %323, %327 : vector<8x64xi1>, vector<8x64xbf16>
    %c8_281 = arith.constant 8 : index
    %c0_282 = arith.constant 0 : index
    %c0_283 = arith.constant 0 : index
    %329 = vector.load %arg9[%c8_281, %c0_282, %c0_283] : memref<9x8x8xbf16, #tpu.memory_space<vmem>>, vector<1x8x8xbf16>
    %330 = vector.shape_cast %329 : vector<1x8x8xbf16> to vector<8x8xbf16>
    %cst_284 = arith.constant dense<0.000000e+00> : vector<8x64xf32>
    %331 = tpu.matmul %330, %328, %cst_284 {dimension_numbers = #tpu.dot_dimension_numbers<[1], [0], [0], [1], [0, 0, 1, 1], [], []>} : vector<8x8xbf16>, vector<8x64xbf16>, vector<8x64xf32> -> vector<8x64xf32>
    %332 = arith.addf %322, %331 : vector<8x64xf32>
    %c0_285 = arith.constant 0 : index
    %c0_286 = arith.constant 0 : index
    %333 = vector.load %arg10[%c0_285, %c0_286] : memref<8x1xf32, #tpu.memory_space<vmem>>, vector<8x1xf32>
    %334 = vector.broadcast %333 : vector<8x1xf32> to vector<8x64xf32>
    %335 = arith.addf %332, %334 : vector<8x64xf32>
    %cst_287 = arith.constant 0.000000e+00 : f32
    %336 = vector.broadcast %cst_287 : f32 to vector<8x64xf32>
    %337 = arith.maximumf %335, %336 : vector<8x64xf32>
    %338 = arith.truncf %337 : vector<8x64xf32> to vector<8x64xbf16>
    %c0_288 = arith.constant 0 : index
    %c16_289 = arith.constant 16 : index
    %339 = vector.load %arg16[%c0_288, %c16_289] : memref<8x96xbf16, #tpu.memory_space<vmem>>, vector<8x64xbf16>
    tpu.vector_store %arg16[%c0_288, %c16_289], %338 {strides = array<i32>} : memref<8x96xbf16, #tpu.memory_space<vmem>>, vector<8x64xbf16>,
    %c0_290 = arith.constant 0 : index
    %c7_291 = arith.constant 7 : index
    %340 = vector.load %arg16[%c0_290, %c7_291] : memref<8x96xbf16, #tpu.memory_space<vmem>>, vector<8x64xbf16>
    %cst_292 = arith.constant 0.000000e+00 : f32
    %341 = arith.truncf %cst_292 : f32 to bf16
    %342 = vector.shape_cast %18 : vector<1x64xi1> to vector<1x64xi1>
    %343 = vector.broadcast %342 : vector<1x64xi1> to vector<8x64xi1>
    %344 = vector.broadcast %341 : bf16 to vector<8x64xbf16>
    %345 = arith.select %343, %340, %344 : vector<8x64xi1>, vector<8x64xbf16>
    %c0_293 = arith.constant 0 : index
    %c0_294 = arith.constant 0 : index
    %c0_295 = arith.constant 0 : index
    %346 = vector.load %arg11[%c0_293, %c0_294, %c0_295] : memref<9x8x8xbf16, #tpu.memory_space<vmem>>, vector<1x8x8xbf16>
    %347 = vector.shape_cast %346 : vector<1x8x8xbf16> to vector<8x8xbf16>
    %cst_296 = arith.constant dense<0.000000e+00> : vector<8x64xf32>
    %348 = tpu.matmul %347, %345, %cst_296 {dimension_numbers = #tpu.dot_dimension_numbers<[1], [0], [0], [1], [0, 0, 1, 1], [], []>} : vector<8x8xbf16>, vector<8x64xbf16>, vector<8x64xf32> -> vector<8x64xf32>
    %c0_297 = arith.constant 0 : index
    %c8_298 = arith.constant 8 : index
    %349 = vector.load %arg16[%c0_297, %c8_298] : memref<8x96xbf16, #tpu.memory_space<vmem>>, vector<8x64xbf16>
    %c1_299 = arith.constant 1 : index
    %c0_300 = arith.constant 0 : index
    %c0_301 = arith.constant 0 : index
    %350 = vector.load %arg11[%c1_299, %c0_300, %c0_301] : memref<9x8x8xbf16, #tpu.memory_space<vmem>>, vector<1x8x8xbf16>
    %351 = vector.shape_cast %350 : vector<1x8x8xbf16> to vector<8x8xbf16>
    %cst_302 = arith.constant dense<0.000000e+00> : vector<8x64xf32>
    %352 = tpu.matmul %351, %349, %cst_302 {dimension_numbers = #tpu.dot_dimension_numbers<[1], [0], [0], [1], [0, 0, 1, 1], [], []>} : vector<8x8xbf16>, vector<8x64xbf16>, vector<8x64xf32> -> vector<8x64xf32>
    %353 = arith.addf %348, %352 : vector<8x64xf32>
    %c0_303 = arith.constant 0 : index
    %c9_304 = arith.constant 9 : index
    %354 = vector.load %arg16[%c0_303, %c9_304] : memref<8x96xbf16, #tpu.memory_space<vmem>>, vector<8x64xbf16>
    %cst_305 = arith.constant 0.000000e+00 : f32
    %355 = arith.truncf %cst_305 : f32 to bf16
    %356 = vector.shape_cast %20 : vector<1x64xi1> to vector<1x64xi1>
    %357 = vector.broadcast %356 : vector<1x64xi1> to vector<8x64xi1>
    %358 = vector.broadcast %355 : bf16 to vector<8x64xbf16>
    %359 = arith.select %357, %354, %358 : vector<8x64xi1>, vector<8x64xbf16>
    %c2_306 = arith.constant 2 : index
    %c0_307 = arith.constant 0 : index
    %c0_308 = arith.constant 0 : index
    %360 = vector.load %arg11[%c2_306, %c0_307, %c0_308] : memref<9x8x8xbf16, #tpu.memory_space<vmem>>, vector<1x8x8xbf16>
    %361 = vector.shape_cast %360 : vector<1x8x8xbf16> to vector<8x8xbf16>
    %cst_309 = arith.constant dense<0.000000e+00> : vector<8x64xf32>
    %362 = tpu.matmul %361, %359, %cst_309 {dimension_numbers = #tpu.dot_dimension_numbers<[1], [0], [0], [1], [0, 0, 1, 1], [], []>} : vector<8x8xbf16>, vector<8x64xbf16>, vector<8x64xf32> -> vector<8x64xf32>
    %363 = arith.addf %353, %362 : vector<8x64xf32>
    %c0_310 = arith.constant 0 : index
    %c15_311 = arith.constant 15 : index
    %364 = vector.load %arg16[%c0_310, %c15_311] : memref<8x96xbf16, #tpu.memory_space<vmem>>, vector<8x64xbf16>
    %cst_312 = arith.constant 0.000000e+00 : f32
    %365 = arith.truncf %cst_312 : f32 to bf16
    %366 = vector.shape_cast %18 : vector<1x64xi1> to vector<1x64xi1>
    %367 = vector.broadcast %366 : vector<1x64xi1> to vector<8x64xi1>
    %368 = vector.broadcast %365 : bf16 to vector<8x64xbf16>
    %369 = arith.select %367, %364, %368 : vector<8x64xi1>, vector<8x64xbf16>
    %c3_313 = arith.constant 3 : index
    %c0_314 = arith.constant 0 : index
    %c0_315 = arith.constant 0 : index
    %370 = vector.load %arg11[%c3_313, %c0_314, %c0_315] : memref<9x8x8xbf16, #tpu.memory_space<vmem>>, vector<1x8x8xbf16>
    %371 = vector.shape_cast %370 : vector<1x8x8xbf16> to vector<8x8xbf16>
    %cst_316 = arith.constant dense<0.000000e+00> : vector<8x64xf32>
    %372 = tpu.matmul %371, %369, %cst_316 {dimension_numbers = #tpu.dot_dimension_numbers<[1], [0], [0], [1], [0, 0, 1, 1], [], []>} : vector<8x8xbf16>, vector<8x64xbf16>, vector<8x64xf32> -> vector<8x64xf32>
    %373 = arith.addf %363, %372 : vector<8x64xf32>
    %c0_317 = arith.constant 0 : index
    %c16_318 = arith.constant 16 : index
    %374 = vector.load %arg16[%c0_317, %c16_318] : memref<8x96xbf16, #tpu.memory_space<vmem>>, vector<8x64xbf16>
    %c4_319 = arith.constant 4 : index
    %c0_320 = arith.constant 0 : index
    %c0_321 = arith.constant 0 : index
    %375 = vector.load %arg11[%c4_319, %c0_320, %c0_321] : memref<9x8x8xbf16, #tpu.memory_space<vmem>>, vector<1x8x8xbf16>
    %376 = vector.shape_cast %375 : vector<1x8x8xbf16> to vector<8x8xbf16>
    %cst_322 = arith.constant dense<0.000000e+00> : vector<8x64xf32>
    %377 = tpu.matmul %376, %374, %cst_322 {dimension_numbers = #tpu.dot_dimension_numbers<[1], [0], [0], [1], [0, 0, 1, 1], [], []>} : vector<8x8xbf16>, vector<8x64xbf16>, vector<8x64xf32> -> vector<8x64xf32>
    %378 = arith.addf %373, %377 : vector<8x64xf32>
    %c0_323 = arith.constant 0 : index
    %c17_324 = arith.constant 17 : index
    %379 = vector.load %arg16[%c0_323, %c17_324] : memref<8x96xbf16, #tpu.memory_space<vmem>>, vector<8x64xbf16>
    %cst_325 = arith.constant 0.000000e+00 : f32
    %380 = arith.truncf %cst_325 : f32 to bf16
    %381 = vector.shape_cast %20 : vector<1x64xi1> to vector<1x64xi1>
    %382 = vector.broadcast %381 : vector<1x64xi1> to vector<8x64xi1>
    %383 = vector.broadcast %380 : bf16 to vector<8x64xbf16>
    %384 = arith.select %382, %379, %383 : vector<8x64xi1>, vector<8x64xbf16>
    %c5_326 = arith.constant 5 : index
    %c0_327 = arith.constant 0 : index
    %c0_328 = arith.constant 0 : index
    %385 = vector.load %arg11[%c5_326, %c0_327, %c0_328] : memref<9x8x8xbf16, #tpu.memory_space<vmem>>, vector<1x8x8xbf16>
    %386 = vector.shape_cast %385 : vector<1x8x8xbf16> to vector<8x8xbf16>
    %cst_329 = arith.constant dense<0.000000e+00> : vector<8x64xf32>
    %387 = tpu.matmul %386, %384, %cst_329 {dimension_numbers = #tpu.dot_dimension_numbers<[1], [0], [0], [1], [0, 0, 1, 1], [], []>} : vector<8x8xbf16>, vector<8x64xbf16>, vector<8x64xf32> -> vector<8x64xf32>
    %388 = arith.addf %378, %387 : vector<8x64xf32>
    %c0_330 = arith.constant 0 : index
    %c23_331 = arith.constant 23 : index
    %389 = vector.load %arg16[%c0_330, %c23_331] : memref<8x96xbf16, #tpu.memory_space<vmem>>, vector<8x64xbf16>
    %cst_332 = arith.constant 0.000000e+00 : f32
    %390 = arith.truncf %cst_332 : f32 to bf16
    %391 = vector.shape_cast %18 : vector<1x64xi1> to vector<1x64xi1>
    %392 = vector.broadcast %391 : vector<1x64xi1> to vector<8x64xi1>
    %393 = vector.broadcast %390 : bf16 to vector<8x64xbf16>
    %394 = arith.select %392, %389, %393 : vector<8x64xi1>, vector<8x64xbf16>
    %c6_333 = arith.constant 6 : index
    %c0_334 = arith.constant 0 : index
    %c0_335 = arith.constant 0 : index
    %395 = vector.load %arg11[%c6_333, %c0_334, %c0_335] : memref<9x8x8xbf16, #tpu.memory_space<vmem>>, vector<1x8x8xbf16>
    %396 = vector.shape_cast %395 : vector<1x8x8xbf16> to vector<8x8xbf16>
    %cst_336 = arith.constant dense<0.000000e+00> : vector<8x64xf32>
    %397 = tpu.matmul %396, %394, %cst_336 {dimension_numbers = #tpu.dot_dimension_numbers<[1], [0], [0], [1], [0, 0, 1, 1], [], []>} : vector<8x8xbf16>, vector<8x64xbf16>, vector<8x64xf32> -> vector<8x64xf32>
    %398 = arith.addf %388, %397 : vector<8x64xf32>
    %c0_337 = arith.constant 0 : index
    %c24_338 = arith.constant 24 : index
    %399 = vector.load %arg16[%c0_337, %c24_338] : memref<8x96xbf16, #tpu.memory_space<vmem>>, vector<8x64xbf16>
    %c7_339 = arith.constant 7 : index
    %c0_340 = arith.constant 0 : index
    %c0_341 = arith.constant 0 : index
    %400 = vector.load %arg11[%c7_339, %c0_340, %c0_341] : memref<9x8x8xbf16, #tpu.memory_space<vmem>>, vector<1x8x8xbf16>
    %401 = vector.shape_cast %400 : vector<1x8x8xbf16> to vector<8x8xbf16>
    %cst_342 = arith.constant dense<0.000000e+00> : vector<8x64xf32>
    %402 = tpu.matmul %401, %399, %cst_342 {dimension_numbers = #tpu.dot_dimension_numbers<[1], [0], [0], [1], [0, 0, 1, 1], [], []>} : vector<8x8xbf16>, vector<8x64xbf16>, vector<8x64xf32> -> vector<8x64xf32>
    %403 = arith.addf %398, %402 : vector<8x64xf32>
    %c0_343 = arith.constant 0 : index
    %c25_344 = arith.constant 25 : index
    %404 = vector.load %arg16[%c0_343, %c25_344] : memref<8x96xbf16, #tpu.memory_space<vmem>>, vector<8x64xbf16>
    %cst_345 = arith.constant 0.000000e+00 : f32
    %405 = arith.truncf %cst_345 : f32 to bf16
    %406 = vector.shape_cast %20 : vector<1x64xi1> to vector<1x64xi1>
    %407 = vector.broadcast %406 : vector<1x64xi1> to vector<8x64xi1>
    %408 = vector.broadcast %405 : bf16 to vector<8x64xbf16>
    %409 = arith.select %407, %404, %408 : vector<8x64xi1>, vector<8x64xbf16>
    %c8_346 = arith.constant 8 : index
    %c0_347 = arith.constant 0 : index
    %c0_348 = arith.constant 0 : index
    %410 = vector.load %arg11[%c8_346, %c0_347, %c0_348] : memref<9x8x8xbf16, #tpu.memory_space<vmem>>, vector<1x8x8xbf16>
    %411 = vector.shape_cast %410 : vector<1x8x8xbf16> to vector<8x8xbf16>
    %cst_349 = arith.constant dense<0.000000e+00> : vector<8x64xf32>
    %412 = tpu.matmul %411, %409, %cst_349 {dimension_numbers = #tpu.dot_dimension_numbers<[1], [0], [0], [1], [0, 0, 1, 1], [], []>} : vector<8x8xbf16>, vector<8x64xbf16>, vector<8x64xf32> -> vector<8x64xf32>
    %413 = arith.addf %403, %412 : vector<8x64xf32>
    %c0_350 = arith.constant 0 : index
    %c0_351 = arith.constant 0 : index
    %414 = vector.load %arg12[%c0_350, %c0_351] : memref<8x1xf32, #tpu.memory_space<vmem>>, vector<8x1xf32>
    %415 = vector.broadcast %414 : vector<8x1xf32> to vector<8x64xf32>
    %416 = arith.addf %413, %415 : vector<8x64xf32>
    %417 = arith.addf %256, %416 : vector<8x64xf32>
    %c0_352 = arith.constant 0 : index
    %c0_353 = arith.constant 0 : index
    %418 = vector.load %arg13[%c0_352, %c0_353] : memref<8x8xbf16, #tpu.memory_space<vmem>>, vector<8x8xbf16>
    %419 = arith.truncf %417 : vector<8x64xf32> to vector<8x64xbf16>
    %cst_354 = arith.constant dense<0.000000e+00> : vector<8x64xf32>
    %420 = tpu.matmul %418, %419, %cst_354 {dimension_numbers = #tpu.dot_dimension_numbers<[1], [0], [0], [1], [0, 0, 1, 1], [], []>} : vector<8x8xbf16>, vector<8x64xbf16>, vector<8x64xf32> -> vector<8x64xf32>
    %c0_355 = arith.constant 0 : index
    %c0_356 = arith.constant 0 : index
    %421 = vector.load %arg14[%c0_355, %c0_356] : memref<8x1xf32, #tpu.memory_space<vmem>>, vector<8x1xf32>
    %422 = vector.broadcast %421 : vector<8x1xf32> to vector<8x64xf32>
    %423 = arith.addf %420, %422 : vector<8x64xf32>
    %c0_357 = arith.constant 0 : index
    %c0_358 = arith.constant 0 : index
    %c0_359 = arith.constant 0 : index
    %424 = vector.load %arg15[%c0_357, %c0_358, %c0_359] : memref<1x8x64xf32, #tpu.memory_space<vmem>>, vector<1x8x64xf32>
    %425 = vector.shape_cast %424 : vector<1x8x64xf32> to vector<8x64xf32>
    %426 = vector.shape_cast %423 : vector<8x64xf32> to vector<1x8x64xf32>
    tpu.vector_store %arg15[%c0_357, %c0_358, %c0_359], %426 {strides = array<i32>} : memref<1x8x64xf32, #tpu.memory_space<vmem>>, vector<1x8x64xf32>,
    return
  }
  func.func @transform_0(%arg0: i32) -> (i32, i32, i32, i32) {
    %c0_i32 = arith.constant 0 : i32
    %c0_i32_0 = arith.constant 0 : i32
    %c0_i32_1 = arith.constant 0 : i32
    %c0_i32_2 = arith.constant 0 : i32
    return %arg0, %c0_i32, %c0_i32_0, %c0_i32_1 : i32, i32, i32, i32
  }
  func.func @transform_1(%arg0: i32) -> (i32, i32) {
    %c0_i32 = arith.constant 0 : i32
    %c0_i32_0 = arith.constant 0 : i32
    %c0_i32_1 = arith.constant 0 : i32
    return %c0_i32, %c0_i32_0 : i32, i32
  }
  func.func @transform_2(%arg0: i32) -> (i32, i32) {
    %c0_i32 = arith.constant 0 : i32
    %c0_i32_0 = arith.constant 0 : i32
    %c0_i32_1 = arith.constant 0 : i32
    return %c0_i32, %c0_i32_0 : i32, i32
  }
  func.func @transform_3(%arg0: i32) -> (i32, i32) {
    %c0_i32 = arith.constant 0 : i32
    %c0_i32_0 = arith.constant 0 : i32
    %c0_i32_1 = arith.constant 0 : i32
    return %c0_i32, %c0_i32_0 : i32, i32
  }
  func.func @transform_4(%arg0: i32) -> (i32, i32, i32) {
    %c0_i32 = arith.constant 0 : i32
    %c0_i32_0 = arith.constant 0 : i32
    %c0_i32_1 = arith.constant 0 : i32
    %c0_i32_2 = arith.constant 0 : i32
    return %c0_i32, %c0_i32_0, %c0_i32_1 : i32, i32, i32
  }
  func.func @transform_5(%arg0: i32) -> (i32, i32) {
    %c0_i32 = arith.constant 0 : i32
    %c0_i32_0 = arith.constant 0 : i32
    %c0_i32_1 = arith.constant 0 : i32
    return %c0_i32, %c0_i32_0 : i32, i32
  }
  func.func @transform_6(%arg0: i32) -> (i32, i32, i32) {
    %c0_i32 = arith.constant 0 : i32
    %c0_i32_0 = arith.constant 0 : i32
    %c0_i32_1 = arith.constant 0 : i32
    %c0_i32_2 = arith.constant 0 : i32
    return %c0_i32, %c0_i32_0, %c0_i32_1 : i32, i32, i32
  }
  func.func @transform_7(%arg0: i32) -> (i32, i32) {
    %c0_i32 = arith.constant 0 : i32
    %c0_i32_0 = arith.constant 0 : i32
    %c0_i32_1 = arith.constant 0 : i32
    return %c0_i32, %c0_i32_0 : i32, i32
  }
  func.func @transform_8(%arg0: i32) -> (i32, i32, i32) {
    %c0_i32 = arith.constant 0 : i32
    %c0_i32_0 = arith.constant 0 : i32
    %c0_i32_1 = arith.constant 0 : i32
    %c0_i32_2 = arith.constant 0 : i32
    return %c0_i32, %c0_i32_0, %c0_i32_1 : i32, i32, i32
  }
  func.func @transform_9(%arg0: i32) -> (i32, i32) {
    %c0_i32 = arith.constant 0 : i32
    %c0_i32_0 = arith.constant 0 : i32
    %c0_i32_1 = arith.constant 0 : i32
    return %c0_i32, %c0_i32_0 : i32, i32
  }
  func.func @transform_10(%arg0: i32) -> (i32, i32, i32) {
    %c0_i32 = arith.constant 0 : i32
    %c0_i32_0 = arith.constant 0 : i32
    %c0_i32_1 = arith.constant 0 : i32
    %c0_i32_2 = arith.constant 0 : i32
    return %c0_i32, %c0_i32_0, %c0_i32_1 : i32, i32, i32
  }
  func.func @transform_11(%arg0: i32) -> (i32, i32) {
    %c0_i32 = arith.constant 0 : i32
    %c0_i32_0 = arith.constant 0 : i32
    %c0_i32_1 = arith.constant 0 : i32
    return %c0_i32, %c0_i32_0 : i32, i32
  }
  func.func @transform_12(%arg0: i32) -> (i32, i32) {
    %c0_i32 = arith.constant 0 : i32
    %c0_i32_0 = arith.constant 0 : i32
    %c0_i32_1 = arith.constant 0 : i32
    return %c0_i32, %c0_i32_0 : i32, i32
  }
  func.func @transform_13(%arg0: i32) -> (i32, i32) {
    %c0_i32 = arith.constant 0 : i32
    %c0_i32_0 = arith.constant 0 : i32
    %c0_i32_1 = arith.constant 0 : i32
    return %c0_i32, %c0_i32_0 : i32, i32
  }
  func.func @transform_14(%arg0: i32) -> (i32, i32, i32) {
    %c0_i32 = arith.constant 0 : i32
    %c0_i32_0 = arith.constant 0 : i32
    %c0_i32_1 = arith.constant 0 : i32
    return %arg0, %c0_i32, %c0_i32_0 : i32, i32, i32
  }
}

</mosaic_0001>

<bundles_post_ra>
// kernel: tpu_custom_call.1
= control target key start
LH: loop header
LB: loop body
LE: loop exit
PB: predicated region body
PF: predicated region fallthrough
CT: control target
= control target key end

     0   :  { %s4970_s0 = inlined_call_operand.vmem [shape: f32[2,4,16,16], index: 0, kind: input, shape index: {}]   ;;  %s4971_s1 = inlined_call_operand.vmem [shape: f32[16,8], index: 1, kind: input, shape index: {}]   ;;  %s4972_s2 = inlined_call_operand.vmem [shape: bf16[8,4], index: 2, kind: input, shape index: {}]   ;;  %s4973_s3 = inlined_call_operand.vmem [shape: f32[8,1], index: 3, kind: input, shape index: {}]   ;;  %s4974_s4 = inlined_call_operand.vmem [shape: bf16[9,8,8], index: 4, kind: input, shape index: {}]   ;;  %s4975_s5 = inlined_call_operand.vmem [shape: f32[8,1], index: 5, kind: input, shape index: {}]   ;;  %s4976_s6 = inlined_call_operand.vmem [shape: bf16[9,8,8], index: 6, kind: input, shape index: {}]   ;;  %s4977_s7 = inlined_call_operand.vmem [shape: f32[8,1], index: 7, kind: input, shape index: {}]   ;;  %s4978_s8 = inlined_call_operand.vmem [shape: bf16[9,8,8], index: 8, kind: input, shape index: {}]   ;;  %s4979_s9 = inlined_call_operand.vmem [shape: f32[8,1], index: 9, kind: input, shape index: {}]   ;;  %s4980_s10 = inlined_call_operand.vmem [shape: bf16[9,8,8], index: 10, kind: input, shape index: {}]   ;;  %s4981_s11 = inlined_call_operand.vmem [shape: f32[8,1], index: 11, kind: input, shape index: {}]   ;;  %s4982_s12 = inlined_call_operand.vmem [shape: bf16[8,8], index: 12, kind: input, shape index: {}]   ;;  %s4983_s13 = inlined_call_operand.vmem [shape: f32[8,1], index: 13, kind: input, shape index: {}]   ;;  %s4984_s14 = inlined_call_operand.hbm [shape: f32[2,8,64], index: 14, kind: output, shape index: {}]  }
   0x1   :  { %5005 = sst [smem:[#allocation8_spill]] %s4970_s0 }
   0x2   :  { %5006 = sst [smem:[#allocation9_spill]] %s4971_s1 }
   0x3   :  { %5007 = sst [smem:[#allocation10_spill]] %s4972_s2 }
   0x4   :  { %5008 = sst [smem:[#allocation11_spill]] %s4973_s3 }
   0x5   :  { %5009 = sst [smem:[#allocation12_spill]] %s4974_s4 }
   0x6   :  { %5010 = sst [smem:[#allocation13_spill]] %s4975_s5 }
   0x7   :  { %5011 = sst [smem:[#allocation14_spill]] %s4976_s6 }
   0x8   :  { %19 = vsyncpa [#allocation5], 0 }
   0x9   :  { %21 = vsyncpa [#allocation5 + $0x1], 0  ;;  %s4291_s29 = smov 0   ;;  %s4293_s30 = smov 0  }
   0xa   :  { %s4295_s15 = smov 0   ;;  %s4297_s16 = smov 0  }
   0xb LB: > { %s4312_s17 = sadd.s32 4294967295, %s4187_s16   ;;  %s3520_s18 = sadd.s32 4294967294, %s4187_s16   ;;  %s4187_s16 = sphi %s4297_s16, %s5036_s16   ;;  %s4183_s15 = sphi %s4295_s15, %s5035_s15   ;;  %s4179_s30 = sphi %s4293_s30, %s5034_s30   ;;  %s4175_s29 = sphi %s4291_s29, %s5033_s29  }
   0xc   : > { %s4316_s19 = sadd.s32 1, %s4187_s16   ;;  %s333_s20 = sadd.s32 1, %s4183_s15 }
   0xd   : > { %s330_s21 = ssub.s32 %s4187_s16, %s4316_s19  ;;  %p343_p0 = scmp.ne.s32.totalorder %s4183_s15, %s4179_s30 }
   0xe   : > { %p331_p1 = scmp.eq.s32.totalorder %s330_s21, 0  ;;  %p344_p2 = scmp.eq.s32.totalorder %s4312_s17, 1 }
   0xf   : > { %p349_p3 = scmp.ne.s32.totalorder %s4179_s30, %s4175_s29  ;;  %p350_p4 = scmp.eq.s32.totalorder %s3520_s18, 1 }
  0x10   : > { %s4327_s22 = scalar_select %p331_p1, %s4183_s15, %s333_s20  }
  0x11   : > { %p4329_p5 = por %p344_p2, %p343_p0  ;;  %p4333_p6 = por %p350_p4, %p349_p3 }
  0x12   : > { %5012 = sst [smem:[#allocation7_spill]] %s4327_s22  ;;  %p3523_p7 = scmp.ge.s32.totalorder %s4187_s16, 1 }
  0x13   : > { %p415_p8 = scmp.lt.s32.totalorder %s4187_s16, 3 }
  0x15   : > { %p416_p9 = pnand %p3523_p7, %p415_p8 }
  0x16   : > { %s5015_s1 = sld [smem:[#allocation9_spill]] (!%p416_p9)  ;;  %p461_p10 = scmp.lt.s32.totalorder (!%p416_p9), %s4312_s17, 1  ;;  %v4189_v2 = vmov (!%p416_p9), 0.0|0.0   ;;  %vm4190_vm0 = vmmov (!%p416_p9), 0   ;;  %v4191_v4 = vmov (!%p416_p9), 0.0   ;;  %vm508_vm1 = vcmask (!%p416_p9), 1041409  }
  0x17   : > { %419 = sbr.rel (%p416_p9) target bundleno = 2839 (0xb17), region = 76  ;;  %4030 = vmatprep.subr.bf16.mxu0 (!%p416_p9), %v4189_v2  ;;  %4033 = vmatprep.subr.bf16.mxu1 (!%p416_p9), %v4189_v2  ;;  %s5016_s0 = sld [smem:[#allocation8_spill]] (!%p416_p9)  ;;  %vm511_vm2 = vcmask (!%p416_p9), 1042434   ;;  %vm514_vm3 = vcmask (!%p416_p9), 1043459   ;;  %vm516_vm4 = vcmask (!%p416_p9), 130048   ;;  %vm589_vm5 = vcmask (!%p416_p9), 60416  }
  0x18   : > { %3750 = vmatprep.mubr.msk.f32.mxu0 (!%p416_p9), %vm4190_vm0, %v4191_v4  ;;  %3757 = vmatprep.mubr.msk.f32.mxu1 (!%p416_p9), %vm4190_vm0, %v4191_v4  ;;  %s4192_s27 = smov (!%p416_p9), 8   ;;  %s4985_s28 = smov (!%p416_p9), 16   ;;  %vm691_vm6 = vcmask (!%p416_p9), 126016   ;;  %vm793_vm7 = vcmask (!%p416_p9), 191616   ;;  %vm895_vm8 = vcmask (!%p416_p9), 257216   ;;  %vm997_vm9 = vcmask (!%p416_p9), 322816  }
  0x19   : > { %s4196_s21 = smov (!%p416_p9), 40   ;;  %s4197_s25 = smov (!%p416_p9), 48   ;;  %vm1099_vm10 = vcmask (!%p416_p9), 388416   ;;  %vm1201_vm11 = vcmask (!%p416_p9), 454016   ;;  %vm1303_vm12 = vcmask (!%p416_p9), 519616   ;;  %vm1318_vm13 = vcmask (!%p416_p9), 1041408  }
  0x1a   : > { %s5017_s3 = sld [smem:[#allocation11_spill]] (!%p416_p9)  ;;  %s5018_s2 = sld [smem:[#allocation10_spill]] (!%p416_p9)  ;;  %vm1314_vm14 = vcmask (!%p416_p9), 31744  }
  0x1b   : > { %s5020_s5 = sld [smem:[#allocation13_spill]] (!%p416_p9)  ;;  %s5021_s4 = sld [smem:[#allocation12_spill]] (!%p416_p9) }
  0x1c   : > { %v501_v0 = vld [vmem:[%s5015_s1] sm:$0xff] (!%p416_p9)  ;;  %v502_v1 = vld [vmem:[%s5015_s1 + $0x8] sm:$0xff] (!%p416_p9)  ;;  %s5028_s1 = smov (!%p416_p9), 104   ;;  %s5030_s6 = sld [smem:[#allocation14_spill]] (!%p416_p9) }
  0x1d   : > { %v4348_v3 = vpack.c.bf16 (!%p416_p9), %v502_v1, %v501_v0 }
  0x1e   : > { %s462_s18 = scalar_select %p461_p10, %s4312_s17, 1 }
  0x1f   : > { %4032 = vmatpush3.bf16.msra.mxu0 %v4348_v3  ;;  %4035 = vmatpush3.bf16.msra.mxu1 %v4348_v3 }
  0x20   : > { %s3641_s20 = sshll.u32 %s462_s18, 6  ;;  %4036 = vmatprep.subr.bf16.mxu0 %v4189_v2  ;;  %4039 = vmatprep.subr.bf16.mxu1 %v4189_v2  ;;  %s4194_s18 = smov 24  }
  0x21   : > { %s4362_s26 = scalar_lea.vmem %s5016_s0, %s3641_s20  ;;  %s4195_s20 = smov 32  }
  0x22   : > { %v489_v5 = vld [vmem:[%s4362_s26] sm:$0x1]  ;;  %v490_v6 = vld [vmem:[%s4362_s26 + $0x10] sm:$0x1]  ;;  %v493_v9 = vld [vmem:[%s4362_s26 + $0x1] sm:$0x1] }
  0x23   : > { %v491_v7 = vld [vmem:[%s4362_s26 + $0x20] sm:$0x1]  ;;  %v492_v8 = vld [vmem:[%s4362_s26 + $0x30] sm:$0x1]  ;;  %v494_v10 = vld [vmem:[%s4362_s26 + $0x11] sm:$0x1]  ;;  %v497_v13 = vadd.f32 %v493_v9, %v489_v5 }
  0x24   : > { %v495_v11 = vld [vmem:[%s4362_s26 + $0x21] sm:$0x1]  ;;  %v496_v12 = vld [vmem:[%s4362_s26 + $0x31] sm:$0x1]  ;;  %v498_v14 = vadd.f32 %v494_v10, %v490_v6  ;;  %v591_v15 = vld [vmem:[%s4362_s26 + $0x2] sm:$0x1] }
  0x25   : > { %v499_v16 = vadd.f32 %v495_v11, %v491_v7  ;;  %v500_v17 = vadd.f32 %v496_v12, %v492_v8  ;;  %v592_v18 = vld [vmem:[%s4362_s26 + $0x12] sm:$0x1]  ;;  %v593_v19 = vld [vmem:[%s4362_s26 + $0x22] sm:$0x1]  ;;  %v595_v22 = vld [vmem:[%s4362_s26 + $0x3] sm:$0x1] }
  0x26   : > { %v594_v20 = vld [vmem:[%s4362_s26 + $0x32] sm:$0x1]  ;;  %v507_v21 = vrot.slane %v498_v14, 7  ;;  %v596_v23 = vld [vmem:[%s4362_s26 + $0x13] sm:$0x1]  ;;  %v599_v28 = vadd.f32 %v595_v22, %v591_v15  ;;  %s5022_s0 = smov 120  }
  0x27   : > { %v510_v24 = vrot.slane %v499_v16, 6  ;;  %v513_v25 = vrot.slane %v500_v17, 5  ;;  %v597_v26 = vld [vmem:[%s4362_s26 + $0x23] sm:$0x1]  ;;  %v598_v27 = vld [vmem:[%s4362_s26 + $0x33] sm:$0x1]  ;;  %v600_v29 = vadd.f32 %v596_v23, %v592_v18 }
  0x28   : > { %v509_v30 = vsel %vm508_vm1, %v507_v21, %v497_v13  ;;  %v601_v31 = vadd.f32 %v597_v26, %v593_v19  ;;  %v602_v32 = vadd.f32 %v598_v27, %v594_v20  ;;  %v693_v33 = vld [vmem:[%s4362_s26 + $0x4] sm:$0x1]  ;;  %v694_v34 = vld [vmem:[%s4362_s26 + $0x14] sm:$0x1]  ;;  %v697_v39 = vld [vmem:[%s4362_s26 + $0x5] sm:$0x1] }
  0x29   : > { %v695_v35 = vld [vmem:[%s4362_s26 + $0x24] sm:$0x1]  ;;  %v512_v36 = vsel %vm511_vm2, %v510_v24, %v509_v30  ;;  %v609_v37 = vrot.slane %v600_v29, 7  ;;  %v696_v38 = vld [vmem:[%s4362_s26 + $0x34] sm:$0x1]  ;;  %v701_v47 = vadd.f32 %v697_v39, %v693_v33 }
  0x2a   : > { %v515_v40 = vsel %vm514_vm3, %v513_v25, %v512_v36  ;;  %v611_v41 = vrot.slane %v601_v31, 6  ;;  %v613_v42 = vrot.slane %v602_v32, 5  ;;  %v698_v43 = vld [vmem:[%s4362_s26 + $0x15] sm:$0x1]  ;;  %v699_v44 = vld [vmem:[%s4362_s26 + $0x25] sm:$0x1] }
  0x2b   : > { %3751 = vmatmul.mubr.msk.f32.vlgmr.msra.gmra.mrb[0].mxu0 %vm516_vm4, %v515_v40  ;;  %v610_v45 = vsel %vm508_vm1, %v609_v37, %v599_v28  ;;  %v700_v46 = vld [vmem:[%s4362_s26 + $0x35] sm:$0x1]  ;;  %v702_v48 = vadd.f32 %v698_v43, %v694_v34  ;;  %v703_v49 = vadd.f32 %v699_v44, %v695_v35  ;;  %v795_v50 = vld [vmem:[%s4362_s26 + $0x6] sm:$0x1]  ;;  %v796_v51 = vld [vmem:[%s4362_s26 + $0x16] sm:$0x1] }
  0x2c   : > { %v612_v52 = vsel %vm511_vm2, %v611_v41, %v610_v45  ;;  %4038 = vmatpush3.bf16.msra.mxu0 %v4348_v3  ;;  %3764 = vmatprep.mubr.msk.f32.mxu0 %vm4190_vm0, %v4191_v4  ;;  %v704_v53 = vadd.f32 %v700_v46, %v696_v38  ;;  %v797_v54 = vld [vmem:[%s4362_s26 + $0x26] sm:$0x1]  ;;  %v798_v55 = vld [vmem:[%s4362_s26 + $0x36] sm:$0x1]  ;;  %v799_v56 = vld [vmem:[%s4362_s26 + $0x7] sm:$0x1] }
  0x2d   : > { %v614_v57 = vsel %vm514_vm3, %v613_v42, %v612_v52  ;;  %v711_v58 = vrot.slane %v702_v48, 7  ;;  %v713_v59 = vrot.slane %v703_v49, 6  ;;  %v800_v60 = vld [vmem:[%s4362_s26 + $0x17] sm:$0x1]  ;;  %v801_v61 = vld [vmem:[%s4362_s26 + $0x27] sm:$0x1]  ;;  %4042 = vmatprep.subr.bf16.mxu0 %v4189_v2  ;;  %v803_v0 = vadd.f32 %v799_v56, %v795_v50 }
  0x2e   : > { %3758 = vmatmul.mubr.msk.f32.vlgmr.msra.gmra.mrb[0].mxu1 %vm516_vm4, %v614_v57  ;;  %v715_v62 = vrot.slane %v704_v53, 5  ;;  %v802_v63 = vld [vmem:[%s4362_s26 + $0x37] sm:$0x1]  ;;  %v804_v1 = vadd.f32 %v800_v60, %v796_v51  ;;  %v805_v5 = vadd.f32 %v801_v61, %v797_v54  ;;  %v897_v6 = vld [vmem:[%s4362_s26 + $0x8] sm:$0x1] }
  0x2f   : > { %4041 = vmatpush3.bf16.msra.mxu1 %v4348_v3  ;;  %3771 = vmatprep.mubr.msk.f32.mxu1 %vm4190_vm0, %v4191_v4  ;;  %v712_v7 = vsel %vm508_vm1, %v711_v58, %v701_v47  ;;  %v806_v8 = vadd.f32 %v802_v63, %v798_v55  ;;  %v898_v9 = vld [vmem:[%s4362_s26 + $0x18] sm:$0x1]  ;;  %v899_v10 = vld [vmem:[%s4362_s26 + $0x28] sm:$0x1]  ;;  %v901_v15 = vld [vmem:[%s4362_s26 + $0x9] sm:$0x1] }
  0x30   : > { %v900_v11 = vld [vmem:[%s4362_s26 + $0x38] sm:$0x1]  ;;  %v714_v12 = vsel %vm511_vm2, %v713_v59, %v712_v7  ;;  %v813_v13 = vrot.slane %v804_v1, 7  ;;  %v815_v14 = vrot.slane %v805_v5, 6  ;;  %4045 = vmatprep.subr.bf16.mxu1 %v4189_v2  ;;  %v902_v16 = vld [vmem:[%s4362_s26 + $0x19] sm:$0x1]  ;;  %v905_v21 = vadd.f32 %v901_v15, %v897_v6 }
  0x31   : > { %v716_v17 = vsel %vm514_vm3, %v715_v62, %v714_v12  ;;  %v817_v18 = vrot.slane %v806_v8, 5  ;;  %v903_v19 = vld [vmem:[%s4362_s26 + $0x29] sm:$0x1]  ;;  %v904_v20 = vld [vmem:[%s4362_s26 + $0x39] sm:$0x1]  ;;  %v906_v22 = vadd.f32 %v902_v16, %v898_v9 }
  0x32   : > { %3765 = vmatmul.mubr.msk.f32.vlgmr.msra.gmra.mrb[2].mxu0 %vm516_vm4, %v716_v17  ;;  %v814_v23 = vsel %vm508_vm1, %v813_v13, %v803_v0  ;;  %v907_v24 = vadd.f32 %v903_v19, %v899_v10  ;;  %v908_v25 = vadd.f32 %v904_v20, %v900_v11  ;;  %v999_v26 = vld [vmem:[%s4362_s26 + $0xa] sm:$0x1]  ;;  %v1000_v27 = vld [vmem:[%s4362_s26 + $0x1a] sm:$0x1]  ;;  %v1003_v32 = vld [vmem:[%s4362_s26 + $0xb] sm:$0x1] }
  0x33   : > { %v1001_v28 = vld [vmem:[%s4362_s26 + $0x2a] sm:$0x1]  ;;  %v816_v29 = vsel %vm511_vm2, %v815_v14, %v814_v23  ;;  %4044 = vmatpush3.bf16.msra.mxu0 %v4348_v3  ;;  %3778 = vmatprep.mubr.msk.f32.mxu0 %vm4190_vm0, %v4191_v4  ;;  %v915_v30 = vrot.slane %v906_v22, 7  ;;  %v1002_v31 = vld [vmem:[%s4362_s26 + $0x3a] sm:$0x1]  ;;  %v1007_v40 = vadd.f32 %v1003_v32, %v999_v26 }
  0x34   : > { %v818_v33 = vsel %vm514_vm3, %v817_v18, %v816_v29  ;;  %v917_v34 = vrot.slane %v907_v24, 6  ;;  %v919_v35 = vrot.slane %v908_v25, 5  ;;  %v1004_v36 = vld [vmem:[%s4362_s26 + $0x1b] sm:$0x1]  ;;  %v1005_v37 = vld [vmem:[%s4362_s26 + $0x2b] sm:$0x1]  ;;  %4048 = vmatprep.subr.bf16.mxu0 %v4189_v2 }
  0x35   : > { %3772 = vmatmul.mubr.msk.f32.vlgmr.msra.gmra.mrb[2].mxu1 %vm516_vm4, %v818_v33  ;;  %v916_v38 = vsel %vm508_vm1, %v915_v30, %v905_v21  ;;  %v1006_v39 = vld [vmem:[%s4362_s26 + $0x3b] sm:$0x1]  ;;  %v1008_v41 = vadd.f32 %v1004_v36, %v1000_v27  ;;  %v1009_v42 = vadd.f32 %v1005_v37, %v1001_v28  ;;  %v1101_v43 = vld [vmem:[%s4362_s26 + $0xc] sm:$0x1]  ;;  %v1102_v44 = vld [vmem:[%s4362_s26 + $0x1c] sm:$0x1] }
  0x36   : > { %4047 = vmatpush3.bf16.msra.mxu1 %v4348_v3  ;;  %3785 = vmatprep.mubr.msk.f32.mxu1 %vm4190_vm0, %v4191_v4  ;;  %v918_v45 = vsel %vm511_vm2, %v917_v34, %v916_v38  ;;  %v1010_v46 = vadd.f32 %v1006_v39, %v1002_v31  ;;  %v1103_v47 = vld [vmem:[%s4362_s26 + $0x2c] sm:$0x1]  ;;  %v1104_v48 = vld [vmem:[%s4362_s26 + $0x3c] sm:$0x1]  ;;  %v1105_v49 = vld [vmem:[%s4362_s26 + $0xd] sm:$0x1] }
  0x37   : > { %v920_v50 = vsel %vm514_vm3, %v919_v35, %v918_v45  ;;  %v1017_v51 = vrot.slane %v1008_v41, 7  ;;  %v1019_v52 = vrot.slane %v1009_v42, 6  ;;  %4051 = vmatprep.subr.bf16.mxu1 %v4189_v2  ;;  %v1106_v53 = vld [vmem:[%s4362_s26 + $0x1d] sm:$0x1]  ;;  %v1107_v54 = vld [vmem:[%s4362_s26 + $0x2d] sm:$0x1]  ;;  %v1109_v57 = vadd.f32 %v1105_v49, %v1101_v43 }
  0x38   : > { %3779 = vmatmul.mubr.msk.f32.vlgmr.msra.gmra.mrb[4].mxu0 %vm516_vm4, %v920_v50  ;;  %v1021_v55 = vrot.slane %v1010_v46, 5  ;;  %v1108_v56 = vld [vmem:[%s4362_s26 + $0x3d] sm:$0x1]  ;;  %v1110_v58 = vadd.f32 %v1106_v53, %v1102_v44  ;;  %v1111_v59 = vadd.f32 %v1107_v54, %v1103_v47  ;;  %v1203_v60 = vld [vmem:[%s4362_s26 + $0xe] sm:$0x1]  ;;  %v1308_v41 = vld [vmem:[%s5017_s3] sm:$0xff]  ;;  %v469_v54 = vlaneseq }
  0x39   : > { %v1018_v61 = vsel %vm508_vm1, %v1017_v51, %v1007_v40  ;;  %4050 = vmatpush3.bf16.msra.mxu0 %v4348_v3  ;;  %3792 = vmatprep.mubr.msk.f32.mxu0 %vm4190_vm0, %v4191_v4  ;;  %v1112_v2 = vadd.f32 %v1108_v56, %v1104_v48  ;;  %v1204_v62 = vld [vmem:[%s4362_s26 + $0x1e] sm:$0x1]  ;;  %v1205_v63 = vld [vmem:[%s4362_s26 + $0x2e] sm:$0x1]  ;;  %v1207_v7 = vld [vmem:[%s4362_s26 + $0xf] sm:$0x1] }
  0x3a   : > { %v1206_v0 = vld [vmem:[%s4362_s26 + $0x3e] sm:$0x1]  ;;  %v1020_v1 = vsel %vm511_vm2, %v1019_v52, %v1018_v61  ;;  %v1119_v5 = vrot.slane %v1110_v58, 7  ;;  %v1121_v6 = vrot.slane %v1111_v59, 6  ;;  %v1208_v8 = vld [vmem:[%s4362_s26 + $0x1f] sm:$0x1]  ;;  %3802 = vmatprep.subr.bf16.mxu0 %v4191_v4  ;;  %v1211_v13 = vadd.f32 %v1207_v7, %v1203_v60 }
  0x3b   : > { %v1022_v9 = vsel %vm514_vm3, %v1021_v55, %v1020_v1  ;;  %v1123_v10 = vrot.slane %v1112_v2, 5  ;;  %v1209_v11 = vld [vmem:[%s4362_s26 + $0x2f] sm:$0x1]  ;;  %v1210_v12 = vld [vmem:[%s4362_s26 + $0x3f] sm:$0x1]  ;;  %v1212_v14 = vadd.f32 %v1208_v8, %v1204_v62  ;;  %s4198_s26 = smov 56  }
  0x3c   : > { %3786 = vmatmul.mubr.msk.f32.vlgmr.msra.gmra.mrb[4].mxu1 %vm516_vm4, %v1022_v9  ;;  %v1120_v15 = vsel %vm508_vm1, %v1119_v5, %v1109_v57  ;;  %v1213_v16 = vadd.f32 %v1209_v11, %v1205_v63  ;;  %v1214_v17 = vadd.f32 %v1210_v12, %v1206_v0  ;;  %v4199_v42 = vmov 0   ;;  %v1306_v53 = vld [vmem:[%s5018_s2] sm:$0xf]  ;;  %s5031_s2 = smov 112  }
  0x3d   : > { %4053 = vmatpush3.bf16.msra.mxu1 %v4348_v3  ;;  %3799 = vmatprep.mubr.msk.f32.mxu1 %vm4190_vm0, %v4191_v4  ;;  %v1122_v18 = vsel %vm511_vm2, %v1121_v6, %v1120_v15  ;;  %v1221_v19 = vrot.slane %v1212_v14, 7  ;;  %v470_v55 = vand.u32 127, %v469_v54 }
  0x3e   : > { %v1124_v20 = vsel %vm514_vm3, %v1123_v10, %v1122_v18  ;;  %v1223_v21 = vrot.slane %v1213_v16, 6  ;;  %v1225_v22 = vrot.slane %v1214_v17, 5  ;;  %3808 = vmatprep.subr.bf16.mxu1 %v4191_v4  ;;  %4119 = vset.pattern.permute.xlu1 %v4199_v42 }
  0x3f   : > { %3793 = vmatmul.mubr.msk.f32.vlgmr.msra.gmra.mrb[6].mxu0 %vm516_vm4, %v1124_v20  ;;  %v1222_v23 = vsel %vm508_vm1, %v1221_v19, %v1211_v13  ;;  %4120 = vset.pattern.permute.xlu0 %v4199_v42  ;;  %v475_v56 = vand.u32 7, %v470_v55 }
  0x40   : > { %v1224_v24 = vsel %vm511_vm2, %v1223_v21, %v1222_v23  ;;  %3804 = vmatprep.mubr.msk.bf16.mxu0 %vm4190_vm0, %v4191_v4  ;;  %vm485_vm2 = vcmask 125952  }
  0x41   : > { %v1226_v3 = vsel %vm514_vm3, %v1225_v22, %v1224_v24  ;;  %vm483_vm15 = vcmp.ne.s32.totalorder %v475_v56, 0  ;;  %vm487_vm3 = vcmask 781952   ;;  %486 = vst.msk [vmem:[#allocation2] sm:$0xf] %vm485_vm2, %v4199_v42 }
  0x42   : > { %3800 = vmatmul.mubr.msk.f32.vlgmr.msra.gmra.mrb[6].mxu1 %vm516_vm4, %v1226_v3  ;;  %vm1374_vm1 = vmpackc.low %vm483_vm15, %vm483_vm15  ;;  %488 = vst.msk [vmem:[#allocation2] sm:$0xf] %vm487_vm3, %v4199_v42  ;;  %vm484_vm4 = vcmp.ne.s32.totalorder %v475_v56, 7  ;;  %v1883_v3 = vld [vmem:[%s5020_s5] sm:$0xff] }
  0x43   : > { %3810 = vmatprep.mubr.msk.bf16.mxu1 %vm4190_vm0, %v4191_v4  ;;  %v1375_v57 = vsel %vm1374_vm1, 65537, %v4199_v42 }
  0xfe   : > { %v585_v25 = vpop.f32.mrb[0].mxu0 }
  0xff   : > { %590 = vst.msk [vmem:[#allocation3] sm:$0xf] %vm589_vm5, %v585_v25  ;;  %v3752_v26 = vpop.f32.mrb[1].mxu0  ;;  %vm1489_vm5 = vmpackc.low %vm484_vm4, %vm484_vm4 }
 0x100   : > { %v1490_v0 = vsel %vm1489_vm5, 65537, %v4199_v42  ;;  %v3548_v42 = vld [vmem:[%s5021_s4 + $0x10] sm:$0xf] }
 0x101   : > { %v683_v27 = vpop.f32.mrb[0].mxu1 }
 0x102   : > { %688 = vrot.lane.b32.xlu0 %v683_v27, %s4192_s27  ;;  %v3759_v28 = vpop.f32.mrb[1].mxu1  ;;  %s4203_s27 = smov 9  }
 0x105   : > { %v785_v29 = vpop.f32.mrb[2].mxu0 }
 0x106   : > { %790 = vrot.lane.b32.xlu0 %v785_v29, %s4985_s28  ;;  %v3766_v30 = vpop.f32.mrb[3].mxu0  ;;  %s4204_s28 = smov 17   ;;  %v3537_v29 = vld [vmem:[%s5021_s4 + $0x4] sm:$0xf] }
 0x107   : > { %v1380_v30 = vld [vmem:[%s5021_s4] sm:$0xf] }
 0x108   : > { %v887_v31 = vpop.f32.mrb[2].mxu1 }
 0x109   : > { %892 = vrot.lane.b32.xlu1 %v887_v31, %s4194_s18  ;;  %v3773_v32 = vpop.f32.mrb[3].mxu1  ;;  %s4205_s18 = smov 25  }
 0x10b   : > { %v989_v33 = vpop.f32.mrb[4].mxu0 }
 0x10c   : > { %v3780_v34 = vpop.f32.mrb[5].mxu0 }
 0x10d   : > { %994 = vrot.lane.b32.xlu1 %v989_v33, %s4195_s20  ;;  %s4200_s20 = smov 7  }
 0x10f   : > { %v1091_v35 = vpop.f32.mrb[4].mxu1 }
 0x110   : > { %v3787_v36 = vpop.f32.mrb[5].mxu1  ;;  %1096 = vrot.lane.b32.xlu0 %v1091_v35, %s4196_s21  ;;  %s4201_s21 = smov 15  }
 0x111   : > { %v3542_v36 = vld [vmem:[%s5021_s4 + $0x8] sm:$0xf] }
 0x112   : > { %v1193_v37 = vpop.f32.mrb[6].mxu0 }
 0x113   : > { %1198 = vrot.lane.b32.xlu1 %v1193_v37, %s4197_s25  ;;  %v3794_v38 = vpop.f32.mrb[7].mxu0  ;;  %s4202_s25 = smov 23  }
 0x114   : > { %v3545_v38 = vld [vmem:[%s5021_s4 + $0xc] sm:$0xf] }
 0x115   : > { %v1295_v39 = vpop.f32.mrb[6].mxu1 }
 0x116   : > { %v3801_v40 = vpop.f32.mrb[7].mxu1  ;;  %1300 = vrot.lane.b32.xlu0 %v1295_v39, %s4198_s26  ;;  %s5019_s26 = smov 16  }
 0x117   : > { %1311 = vperm.xlu1 %4119, %v1308_v41  }
 0x11b   : > { %1376 = vrot.lane.b32.xlu1 %v1375_v57, %s4200_s20  ;;  %s4993_s20 = smov 120  }
 0x11f   : > { %1549 = vrot.lane.b32.xlu1 %v1375_v57, %s4201_s21  ;;  %s4991_s21 = smov 121  }
 0x123   : > { %1716 = vrot.lane.b32.xlu1 %v1375_v57, %s4202_s25  ;;  %s4987_s25 = smov 119  }
 0x174   : > { %v689_v43 = vpop.permute.xlu0 %688 }
 0x175   : > { %692 = vst.msk [vmem:[#allocation3] sm:$0xf] %vm691_vm6, %v689_v43  ;;  %vm1369_vm6 = vcmask 650368  }
 0x178   : > { %v791_v44 = vpop.permute.xlu0 %790 }
 0x179   : > { %794 = vst.msk [vmem:[#allocation3] sm:$0xf] %vm793_vm7, %v791_v44  ;;  %v3550_v44 = vld [vmem:[%s5021_s4 + $0x14] sm:$0xf] }
 0x17b   : > { %v893_v45 = vpop.permute.xlu1 %892 }
 0x17c   : > { %896 = vst.msk [vmem:[#allocation3] sm:$0xf] %vm895_vm8, %v893_v45 }
 0x17f   : > { %v995_v46 = vpop.permute.xlu1 %994 }
 0x180   : > { %998 = vst.msk [vmem:[#allocation3] sm:$0xf] %vm997_vm9, %v995_v46 }
 0x182   : > { %v1097_v47 = vpop.permute.xlu0 %1096 }
 0x183   : > { %1100 = vst.msk [vmem:[#allocation3] sm:$0xf] %vm1099_vm10, %v1097_v47 }
 0x185   : > { %v1199_v48 = vpop.permute.xlu1 %1198 }
 0x186   : > { %1202 = vst.msk [vmem:[#allocation3] sm:$0xf] %vm1201_vm11, %v1199_v48  ;;  %v3553_v48 = vld [vmem:[%s5021_s4 + $0x18] sm:$0xf] }
 0x188   : > { %v1301_v49 = vpop.permute.xlu0 %1300 }
 0x189   : > { %1304 = vst.msk [vmem:[#allocation3] sm:$0xf] %vm1303_vm12, %v1301_v49  ;;  %v3556_v49 = vld [vmem:[%s5021_s4 + $0x1c] sm:$0xf] }
 0x190   : > { %v1305_v50 = vld [vmem:[#allocation3] sm:$0xf] }
 0x191   : > { %v1307_v51 = vpack.c.bf16 %v1305_v50, %v1305_v50 }
 0x193   : > { %v1320_v52 = vsel %vm1318_vm13, %v1307_v51, 0  ;;  %vm1392_vm13 = vcmask 1043456   ;;  %v3558_v51 = vld [vmem:[%s5021_s4 + $0x20] sm:$0xf]  ;;  %s5029_s4 = smov 103  }
 0x194   : > { %3803 = vmatpush3.bf16.msra.mxu0 %v1320_v52 }
 0x195   : > { %3814 = vmatprep.subr.bf16.mxu0 %v4191_v4 }
 0x196   : > { %v1312_v58 = vpop.permute.xlu1 %1311 }
 0x197   : > { %3805 = vmatmul.mubr.msk.bf16.vlgmr.msra.gmra.mrb[8].mxu0 %vm1314_vm14, %v1306_v53  ;;  %vm1388_vm14 = vcmask 64512  }
 0x198   : > { %3816 = vmatprep.mubr.msk.bf16.mxu0 %vm4190_vm0, %v4191_v4 }
 0x19a   : > { %v4503_v1 = vpop.permute.xlu1 %1376 }
 0x19b   : > { %vm1378_vm7 = vcmp.ne.s16.totalorder %v4503_v1, 0 }
 0x19e   : > { %v4509_v7 = vpop.permute.xlu1 %1549 }
 0x19f   : > { %vm1551_vm9 = vcmp.ne.s16.totalorder %v4509_v7, 0 }
 0x1a2   : > { %v4522_v15 = vpop.permute.xlu1 %1716 }
 0x1a3   : > { %vm1718_vm11 = vcmp.ne.s16.totalorder %v4522_v15, 0  ;;  %v3393_v15 = vld [vmem:[%s4983_s13] sm:$0xff] }
 0x26a   : > { %v1356_v59 = vpop.f32.mrb[8].mxu0 }
 0x26b   : > { %v4498_v60 = vadd.f32 %v1356_v59, %v1312_v58  ;;  %v3806_v61 = vpop.f32.mrb[9].mxu0 }
 0x26c   : > { %v1359_v2 = vpop.f32.mrb[10].mxu0 }
 0x26d   : > { %v3642_v62 = vpack.c.bf16 %v4498_v60, %v4498_v60  ;;  %v3807_v63 = vpop.f32.mrb[11].mxu0 }
 0x26f   : > { %1366 = vrot.lane.b32.xlu0 %v3642_v62, %s5019_s26 }
 0x273   : > { %1491 = vrot.lane.b32.xlu0 %v1490_v0, %s4203_s27  ;;  %s4989_s27 = smov 113  }
 0x277   : > { %1658 = vrot.lane.b32.xlu0 %v1490_v0, %s4204_s28  ;;  %s5003_s28 = smov 112  }
 0x27b   : > { %1825 = vrot.lane.b32.xlu0 %v1490_v0, %s4205_s18  ;;  %s4997_s18 = smov 111  }
 0x2e1   : > { %v1367_v5 = vpop.permute.xlu0 %1366 }
 0x2e2   : > { %1370 = vst.msk [vmem:[#allocation2] sm:$0xf] %vm1369_vm6, %v1367_v5 }
 0x2e5   : > { %v4506_v6 = vpop.permute.xlu0 %1491 }
 0x2e6   : > { %vm1493_vm8 = vcmp.ne.s16.totalorder %v4506_v6, 0 }
 0x2e9   : > { %v1371_v8 = vld [vmem:[#allocation2] sm:$0xf]  ;;  %v4513_v9 = vpop.permute.xlu0 %1658 }
 0x2ea   : > { %v3538_v10 = vcombine.low %v1371_v8, %v1371_v8  ;;  %v1379_v11 = vsel %vm1378_vm7, %v1371_v8, 0  ;;  %v1494_v13 = vsel %vm1493_vm8, %v1371_v8, 0  ;;  %v1552_v14 = vsel %vm1551_vm9, %v1371_v8, 0 }
 0x2eb   : > { %v3540_v12 = vcombine.low %v1379_v11, %v1379_v11  ;;  %vm1660_vm10 = vcmp.ne.s16.totalorder %v4513_v9, 0  ;;  %v3543_v16 = vcombine.low %v1494_v13, %v1494_v13  ;;  %v3546_v17 = vcombine.low %v1552_v14, %v1552_v14 }
 0x2ec   : > { %1386 = vrot.lane.b32.xlu1 %v3538_v10, %s4993_s20  ;;  %v1661_v18 = vsel %vm1660_vm10, %v1371_v8, 0  ;;  %v1719_v21 = vsel %vm1718_vm11, %v1371_v8, 0  ;;  %s5023_s20 = smov 121  }
 0x2ed   : > { %1439 = vrot.lane.b32.xlu0 %v3540_v12, %s4991_s21  ;;  %v4530_v19 = vpop.permute.xlu0 %1825  ;;  %v3551_v20 = vcombine.low %v1661_v18, %v1661_v18  ;;  %v3554_v22 = vcombine.low %v1719_v21, %v1719_v21  ;;  %s4999_s21 = smov 103  }
 0x2ee   : > { %vm1827_vm12 = vcmp.ne.s16.totalorder %v4530_v19, 0 }
 0x2ef   : > { %v1828_v23 = vsel %vm1827_vm12, %v1371_v8, 0 }
 0x2f0   : > { %1500 = vrot.lane.b32.xlu1 %v3543_v16, %s4987_s25  ;;  %s4995_s25 = smov 105   ;;  %v3559_v24 = vcombine.low %v1828_v23, %v1828_v23 }
 0x2f1   : > { %1558 = vrot.lane.b32.xlu0 %v3546_v17, %s4989_s27  ;;  %s5001_s27 = smov 104  }
 0x2f4   : > { %1609 = vrot.lane.b32.xlu1 %v3538_v10, %s5003_s28 }
 0x2f5   : > { %1667 = vrot.lane.b32.xlu0 %v3551_v20, %s4997_s18  ;;  %s5026_s18 = smov 111  }
 0x2f8   : > { %1725 = vrot.lane.b32.xlu1 %v3554_v22, %s4995_s25  ;;  %s5025_s25 = smov 113  }
 0x2f9   : > { %1776 = vrot.lane.b32.xlu0 %v3538_v10, %s5001_s27  ;;  %s5027_s27 = smov 105  }
 0x2fc   : > { %1834 = vrot.lane.b32.xlu1 %v3559_v24, %s4999_s21  ;;  %s5024_s21 = smov 119  }
 0x2fd   : > { %1886 = vperm.xlu0 %4120, %v1883_v3  }
 0x35e   : > { %v1387_v25 = vpop.permute.xlu1 %1386 }
 0x35f   : > { %v1394_v26 = vsel %vm1392_vm13, %v1387_v25, 0  ;;  %v1440_v27 = vpop.permute.xlu0 %1439 }
 0x360   : > { %v1445_v28 = vsel %vm1392_vm13, %v1440_v27, 0  ;;  %3809 = vmatpush3.bf16.msra.mxu1 %v1394_v26 }
 0x361   : > { %3815 = vmatpush3.bf16.msra.mxu0 %v1445_v28  ;;  %3820 = vmatprep.subr.bf16.mxu1 %v4191_v4 }
 0x362   : > { %v1501_v31 = vpop.permute.xlu1 %1500  ;;  %3826 = vmatprep.subr.bf16.mxu0 %v4191_v4 }
 0x363   : > { %v1506_v32 = vsel %vm1392_vm13, %v1501_v31, 0  ;;  %3811 = vmatmul.mubr.msk.bf16.vlgmr.msra.gmra.mrb[8].mxu1 %vm1388_vm14, %v3537_v29  ;;  %v1559_v33 = vpop.permute.xlu0 %1558 }
 0x364   : > { %v1564_v34 = vsel %vm1392_vm13, %v1559_v33, 0  ;;  %3817 = vmatmul.mubr.msk.bf16.vlgmr.msra.gmra.mrb[12].mxu0 %vm1388_vm14, %v1380_v30  ;;  %3821 = vmatpush3.bf16.msra.mxu1 %v1506_v32 }
 0x365   : > { %3827 = vmatpush3.bf16.msra.mxu0 %v1564_v34  ;;  %3822 = vmatprep.mubr.msk.bf16.mxu1 %vm4190_vm0, %v4191_v4 }
 0x366   : > { %3832 = vmatprep.subr.bf16.mxu1 %v4191_v4  ;;  %3828 = vmatprep.mubr.msk.bf16.mxu0 %vm4190_vm0, %v4191_v4  ;;  %v1610_v35 = vpop.permute.xlu1 %1609 }
 0x367   : > { %3838 = vmatprep.subr.bf16.mxu0 %v4191_v4  ;;  %v1668_v37 = vpop.permute.xlu0 %1667  ;;  %v1615_v39 = vsel %vm1392_vm13, %v1610_v35, 0 }
 0x368   : > { %v1673_v40 = vsel %vm1392_vm13, %v1668_v37, 0 }
 0x36a   : > { %v1726_v41 = vpop.permute.xlu1 %1725 }
 0x36b   : > { %3823 = vmatmul.mubr.msk.bf16.vlgmr.msra.gmra.mrb[12].mxu1 %vm1388_vm14, %v3542_v36  ;;  %v1777_v43 = vpop.permute.xlu0 %1776  ;;  %v1731_v45 = vsel %vm1392_vm13, %v1726_v41, 0 }
 0x36c   : > { %3833 = vmatpush3.bf16.msra.mxu1 %v1615_v39  ;;  %3829 = vmatmul.mubr.msk.bf16.vlgmr.msra.gmra.mrb[16].mxu0 %vm1388_vm14, %v3545_v38  ;;  %v1782_v46 = vsel %vm1392_vm13, %v1777_v43, 0 }
 0x36d   : > { %3839 = vmatpush3.bf16.msra.mxu0 %v1673_v40  ;;  %3834 = vmatprep.mubr.msk.bf16.mxu1 %vm4190_vm0, %v4191_v4 }
 0x36e   : > { %3844 = vmatprep.subr.bf16.mxu1 %v4191_v4  ;;  %3840 = vmatprep.mubr.msk.bf16.mxu0 %vm4190_vm0, %v4191_v4  ;;  %v1835_v47 = vpop.permute.xlu1 %1834 }
 0x36f   : > { %3850 = vmatprep.subr.bf16.mxu0 %v4191_v4  ;;  %v1840_v50 = vsel %vm1392_vm13, %v1835_v47, 0 }
 0x373   : > { %3835 = vmatmul.mubr.msk.bf16.vlgmr.msra.gmra.mrb[16].mxu1 %vm1388_vm14, %v3548_v42 }
 0x374   : > { %3845 = vmatpush3.bf16.msra.mxu1 %v1731_v45  ;;  %3841 = vmatmul.mubr.msk.bf16.vlgmr.msra.gmra.mrb[20].mxu0 %vm1388_vm14, %v3550_v44 }
 0x375   : > { %3851 = vmatpush3.bf16.msra.mxu0 %v1782_v46  ;;  %3846 = vmatprep.mubr.msk.bf16.mxu1 %vm4190_vm0, %v4191_v4 }
 0x376   : > { %3856 = vmatprep.subr.bf16.mxu1 %v4191_v4  ;;  %3852 = vmatprep.mubr.msk.bf16.mxu0 %vm4190_vm0, %v4191_v4 }
 0x377   : > { %3862 = vmatprep.subr.bf16.mxu0 %v4191_v4 }
 0x37b   : > { %3847 = vmatmul.mubr.msk.bf16.vlgmr.msra.gmra.mrb[20].mxu1 %vm1388_vm14, %v3553_v48 }
 0x37c   : > { %3857 = vmatpush3.bf16.msra.mxu1 %v1840_v50  ;;  %3853 = vmatmul.mubr.msk.bf16.vlgmr.msra.gmra.mrb[24].mxu0 %vm1388_vm14, %v3556_v49  ;;  %v1887_v36 = vpop.permute.xlu0 %1886 }
 0x37d   : > { %3858 = vmatprep.mubr.msk.bf16.mxu1 %vm4190_vm0, %v4191_v4  ;;  %3868 = vmatprep.subr.bf16.mxu1 %v4191_v4 }
 0x37e   : > { %3864 = vmatprep.mubr.msk.bf16.mxu0 %vm4190_vm0, %v4191_v4 }
 0x383   : > { %3859 = vmatmul.mubr.msk.bf16.vlgmr.msra.gmra.mrb[24].mxu1 %vm1388_vm14, %v3558_v51 }
 0x384   : > { %3870 = vmatprep.mubr.msk.bf16.mxu1 %vm4190_vm0, %v4191_v4 }
 0x436   : > { %v1430_v52 = vpop.f32.mrb[8].mxu1 }
 0x437   : > { %v3812_v53 = vpop.f32.mrb[9].mxu1  ;;  %v1481_v54 = vpop.f32.mrb[12].mxu0 }
 0x438   : > { %v1482_v55 = vadd.f32 %v1481_v54, %v1430_v52  ;;  %v1433_v56 = vpop.f32.mrb[10].mxu1  ;;  %v3818_v57 = vpop.f32.mrb[13].mxu0 }
 0x439   : > { %v3813_v58 = vpop.f32.mrb[11].mxu1  ;;  %v1484_v59 = vpop.f32.mrb[14].mxu0 }
 0x43a   : > { %v3819_v61 = vpop.f32.mrb[15].mxu0  ;;  %v2383_v59 = vld [vmem:[%s4977_s7] sm:$0xff] }
 0x43e   : > { %v1542_v2 = vpop.f32.mrb[12].mxu1 }
 0x43f   : > { %v1548_v62 = vadd.f32 %v1542_v2, %v1482_v55  ;;  %v3824_v63 = vpop.f32.mrb[13].mxu1  ;;  %v1600_v0 = vpop.f32.mrb[16].mxu0 }
 0x440   : > { %v1545_v5 = vpop.f32.mrb[14].mxu1  ;;  %v3830_v8 = vpop.f32.mrb[17].mxu0 }
 0x441   : > { %v1606_v10 = vadd.f32 %v1600_v0, %v1548_v62  ;;  %v3825_v11 = vpop.f32.mrb[15].mxu1  ;;  %v1603_v12 = vpop.f32.mrb[18].mxu0  ;;  %v3562_v0 = vld [vmem:[%s5030_s6 + $0x4] sm:$0xf]  ;;  %v1901_v5 = vld [vmem:[%s5030_s6] sm:$0xf] }
 0x442   : > { %v3831_v13 = vpop.f32.mrb[19].mxu0 }
 0x446   : > { %v1651_v14 = vpop.f32.mrb[16].mxu1 }
 0x447   : > { %v1657_v16 = vadd.f32 %v1651_v14, %v1606_v10  ;;  %v3836_v17 = vpop.f32.mrb[17].mxu1  ;;  %v1709_v18 = vpop.f32.mrb[20].mxu0  ;;  %v3567_v14 = vld [vmem:[%s5030_s6 + $0x8] sm:$0xf] }
 0x448   : > { %v1654_v20 = vpop.f32.mrb[18].mxu1  ;;  %v3842_v21 = vpop.f32.mrb[21].mxu0  ;;  %v3570_v17 = vld [vmem:[%s5030_s6 + $0xc] sm:$0xf] }
 0x449   : > { %v1715_v22 = vadd.f32 %v1709_v18, %v1657_v16  ;;  %v3837_v23 = vpop.f32.mrb[19].mxu1  ;;  %v1712_v24 = vpop.f32.mrb[22].mxu0 }
 0x44a   : > { %v3843_v3 = vpop.f32.mrb[23].mxu0  ;;  %v3575_v24 = vld [vmem:[%s5030_s6 + $0x14] sm:$0xf] }
 0x44e   : > { %v1767_v25 = vpop.f32.mrb[20].mxu1 }
 0x44f   : > { %v1773_v26 = vadd.f32 %v1767_v25, %v1715_v22  ;;  %v3848_v27 = vpop.f32.mrb[21].mxu1  ;;  %v1818_v28 = vpop.f32.mrb[24].mxu0  ;;  %v3573_v22 = vld [vmem:[%s5030_s6 + $0x10] sm:$0xf] }
 0x450   : > { %v1770_v29 = vpop.f32.mrb[22].mxu1  ;;  %v3854_v30 = vpop.f32.mrb[25].mxu0  ;;  %v3578_v27 = vld [vmem:[%s5030_s6 + $0x18] sm:$0xf] }
 0x451   : > { %v1824_v31 = vadd.f32 %v1818_v28, %v1773_v26  ;;  %v3849_v32 = vpop.f32.mrb[23].mxu1  ;;  %v1821_v33 = vpop.f32.mrb[26].mxu0  ;;  %v3581_v28 = vld [vmem:[%s5030_s6 + $0x1c] sm:$0xf]  ;;  %v3583_v30 = vld [vmem:[%s5030_s6 + $0x20] sm:$0xf] }
 0x452   : > { %v3855_v34 = vpop.f32.mrb[27].mxu0  ;;  %s3638_s6 = sshll.u32 %s4312_s17, 7 }
 0x456   : > { %v1876_v35 = vpop.f32.mrb[24].mxu1 }
 0x457   : > { %v1882_v37 = vadd.f32 %v1876_v35, %v1824_v31  ;;  %v3860_v38 = vpop.f32.mrb[25].mxu1 }
 0x458   : > { %v1879_v39 = vpop.f32.mrb[26].mxu1 }
 0x459   : > { %v1889_v40 = vadd.f32 %v1887_v36, %v1882_v37  ;;  %v3861_v41 = vpop.f32.mrb[27].mxu1 }
 0x45b   : > { %v1890_v42 = vmax.f32 %v1889_v40, 0.0 }
 0x45d   : > { %v3643_v43 = vpack.c.bf16 %v1890_v42, %v1890_v42 }
 0x45f   : > { %1895 = vrot.lane.b32.xlu1 %v3643_v43, %s5019_s26 }
 0x4d1   : > { %v1896_v44 = vpop.permute.xlu1 %1895 }
 0x4d2   : > { %1898 = vst.msk [vmem:[#allocation2] sm:$0xf] %vm1369_vm6, %v1896_v44 }
 0x4d9   : > { %v1899_v45 = vld [vmem:[#allocation2] sm:$0xf] }
 0x4da   : > { %v3563_v46 = vcombine.low %v1899_v45, %v1899_v45  ;;  %v1900_v47 = vsel %vm1378_vm7, %v1899_v45, 0  ;;  %v2006_v49 = vsel %vm1493_vm8, %v1899_v45, 0  ;;  %v2061_v50 = vsel %vm1551_vm9, %v1899_v45, 0 }
 0x4db   : > { %v3565_v48 = vcombine.low %v1900_v47, %v1900_v47  ;;  %v3568_v51 = vcombine.low %v2006_v49, %v2006_v49  ;;  %v3571_v52 = vcombine.low %v2061_v50, %v2061_v50  ;;  %v2167_v53 = vsel %vm1660_vm10, %v1899_v45, 0 }
 0x4dc   : > { %1907 = vrot.lane.b32.xlu1 %v3563_v46, %s5022_s0  ;;  %v3576_v54 = vcombine.low %v2167_v53, %v2167_v53  ;;  %v2222_v55 = vsel %vm1718_vm11, %v1899_v45, 0  ;;  %v2328_v57 = vsel %vm1827_vm12, %v1899_v45, 0 }
 0x4dd   : > { %1958 = vrot.lane.b32.xlu0 %v3565_v48, %s5023_s20  ;;  %v3579_v56 = vcombine.low %v2222_v55, %v2222_v55  ;;  %v3584_v58 = vcombine.low %v2328_v57, %v2328_v57 }
 0x4e0   : > { %2012 = vrot.lane.b32.xlu1 %v3568_v51, %s5024_s21 }
 0x4e1   : > { %2067 = vrot.lane.b32.xlu0 %v3571_v52, %s5025_s25 }
 0x4e4   : > { %2118 = vrot.lane.b32.xlu1 %v3563_v46, %s5003_s28 }
 0x4e5   : > { %2173 = vrot.lane.b32.xlu0 %v3576_v54, %s5026_s18 }
 0x4e8   : > { %2228 = vrot.lane.b32.xlu1 %v3579_v56, %s5027_s27 }
 0x4e9   : > { %2279 = vrot.lane.b32.xlu0 %v3563_v46, %s5028_s1 }
 0x4ec   : > { %2334 = vrot.lane.b32.xlu1 %v3584_v58, %s5029_s4 }
 0x4ed   : > { %2386 = vperm.xlu0 %4120, %v2383_v59  }
 0x54e   : > { %v1908_v61 = vpop.permute.xlu1 %1907 }
 0x54f   : > { %v1913_v2 = vsel %vm1392_vm13, %v1908_v61, 0  ;;  %v1959_v62 = vpop.permute.xlu0 %1958 }
 0x550   : > { %v1964_v63 = vsel %vm1392_vm13, %v1959_v62, 0  ;;  %3863 = vmatpush3.bf16.msra.mxu0 %v1913_v2 }
 0x551   : > { %3869 = vmatpush3.bf16.msra.mxu1 %v1964_v63  ;;  %3874 = vmatprep.subr.bf16.mxu0 %v4191_v4 }
 0x552   : > { %v2013_v8 = vpop.permute.xlu1 %2012  ;;  %3880 = vmatprep.subr.bf16.mxu1 %v4191_v4 }
 0x553   : > { %v2018_v10 = vsel %vm1392_vm13, %v2013_v8, 0  ;;  %3865 = vmatmul.mubr.msk.bf16.vlgmr.msra.gmra.mrb[28].mxu0 %vm1388_vm14, %v3562_v0  ;;  %v2068_v11 = vpop.permute.xlu0 %2067 }
 0x554   : > { %v2073_v12 = vsel %vm1392_vm13, %v2068_v11, 0  ;;  %3871 = vmatmul.mubr.msk.bf16.vlgmr.msra.gmra.mrb[28].mxu1 %vm1388_vm14, %v1901_v5  ;;  %3875 = vmatpush3.bf16.msra.mxu0 %v2018_v10 }
 0x555   : > { %3881 = vmatpush3.bf16.msra.mxu1 %v2073_v12  ;;  %3876 = vmatprep.mubr.msk.bf16.mxu0 %vm4190_vm0, %v4191_v4 }
 0x556   : > { %3886 = vmatprep.subr.bf16.mxu0 %v4191_v4  ;;  %3882 = vmatprep.mubr.msk.bf16.mxu1 %vm4190_vm0, %v4191_v4  ;;  %v2119_v13 = vpop.permute.xlu1 %2118 }
 0x557   : > { %3892 = vmatprep.subr.bf16.mxu1 %v4191_v4  ;;  %v2174_v16 = vpop.permute.xlu0 %2173  ;;  %v2124_v18 = vsel %vm1392_vm13, %v2119_v13, 0 }
 0x558   : > { %v2179_v20 = vsel %vm1392_vm13, %v2174_v16, 0 }
 0x55a   : > { %v2229_v21 = vpop.permute.xlu1 %2228 }
 0x55b   : > { %3877 = vmatmul.mubr.msk.bf16.vlgmr.msra.gmra.mrb[32].mxu0 %vm1388_vm14, %v3567_v14  ;;  %v2280_v23 = vpop.permute.xlu0 %2279  ;;  %v2234_v3 = vsel %vm1392_vm13, %v2229_v21, 0 }
 0x55c   : > { %3887 = vmatpush3.bf16.msra.mxu0 %v2124_v18  ;;  %3883 = vmatmul.mubr.msk.bf16.vlgmr.msra.gmra.mrb[32].mxu1 %vm1388_vm14, %v3570_v17  ;;  %v2285_v25 = vsel %vm1392_vm13, %v2280_v23, 0 }
 0x55d   : > { %3893 = vmatpush3.bf16.msra.mxu1 %v2179_v20  ;;  %3888 = vmatprep.mubr.msk.bf16.mxu0 %vm4190_vm0, %v4191_v4 }
 0x55e   : > { %3898 = vmatprep.subr.bf16.mxu0 %v4191_v4  ;;  %3894 = vmatprep.mubr.msk.bf16.mxu1 %vm4190_vm0, %v4191_v4  ;;  %v2335_v26 = vpop.permute.xlu1 %2334 }
 0x55f   : > { %3904 = vmatprep.subr.bf16.mxu1 %v4191_v4  ;;  %v2340_v29 = vsel %vm1392_vm13, %v2335_v26, 0 }
 0x563   : > { %3889 = vmatmul.mubr.msk.bf16.vlgmr.msra.gmra.mrb[36].mxu0 %vm1388_vm14, %v3573_v22 }
 0x564   : > { %3899 = vmatpush3.bf16.msra.mxu0 %v2234_v3  ;;  %3895 = vmatmul.mubr.msk.bf16.vlgmr.msra.gmra.mrb[36].mxu1 %vm1388_vm14, %v3575_v24 }
 0x565   : > { %3905 = vmatpush3.bf16.msra.mxu1 %v2285_v25  ;;  %3900 = vmatprep.mubr.msk.bf16.mxu0 %vm4190_vm0, %v4191_v4 }
 0x566   : > { %3910 = vmatprep.subr.bf16.mxu0 %v4191_v4  ;;  %3906 = vmatprep.mubr.msk.bf16.mxu1 %vm4190_vm0, %v4191_v4 }
 0x567   : > { %3916 = vmatprep.subr.bf16.mxu1 %v4191_v4 }
 0x56b   : > { %3901 = vmatmul.mubr.msk.bf16.vlgmr.msra.gmra.mrb[40].mxu0 %vm1388_vm14, %v3578_v27 }
 0x56c   : > { %3911 = vmatpush3.bf16.msra.mxu0 %v2340_v29  ;;  %3907 = vmatmul.mubr.msk.bf16.vlgmr.msra.gmra.mrb[40].mxu1 %vm1388_vm14, %v3581_v28  ;;  %v2387_v17 = vpop.permute.xlu0 %2386 }
 0x56d   : > { %3912 = vmatprep.mubr.msk.bf16.mxu0 %vm4190_vm0, %v4191_v4  ;;  %3922 = vmatprep.subr.bf16.mxu0 %v4191_v4 }
 0x56e   : > { %3918 = vmatprep.mubr.msk.bf16.mxu1 %vm4190_vm0, %v4191_v4 }
 0x573   : > { %3913 = vmatmul.mubr.msk.bf16.vlgmr.msra.gmra.mrb[44].mxu0 %vm1388_vm14, %v3583_v30 }
 0x574   : > { %3924 = vmatprep.mubr.msk.bf16.mxu0 %vm4190_vm0, %v4191_v4 }
 0x626   : > { %v1949_v31 = vpop.f32.mrb[28].mxu0 }
 0x627   : > { %v3866_v32 = vpop.f32.mrb[29].mxu0  ;;  %v2000_v33 = vpop.f32.mrb[28].mxu1 }
 0x628   : > { %v2001_v34 = vadd.f32 %v2000_v33, %v1949_v31  ;;  %v1952_v35 = vpop.f32.mrb[30].mxu0  ;;  %v3872_v36 = vpop.f32.mrb[29].mxu1 }
 0x629   : > { %v3867_v37 = vpop.f32.mrb[31].mxu0  ;;  %v2003_v38 = vpop.f32.mrb[30].mxu1 }
 0x62a   : > { %v3873_v39 = vpop.f32.mrb[31].mxu1  ;;  %v2883_v37 = vld [vmem:[%s4979_s9] sm:$0xff] }
 0x62e   : > { %v2054_v40 = vpop.f32.mrb[32].mxu0 }
 0x62f   : > { %v2060_v41 = vadd.f32 %v2054_v40, %v2001_v34  ;;  %v3878_v42 = vpop.f32.mrb[33].mxu0  ;;  %v2109_v43 = vpop.f32.mrb[32].mxu1 }
 0x630   : > { %v2057_v44 = vpop.f32.mrb[34].mxu0  ;;  %v3884_v45 = vpop.f32.mrb[33].mxu1  ;;  %v3587_v42 = vld [vmem:[%s4978_s8 + $0x4] sm:$0xf] }
 0x631   : > { %v2115_v46 = vadd.f32 %v2109_v43, %v2060_v41  ;;  %v3879_v47 = vpop.f32.mrb[35].mxu0  ;;  %v2112_v48 = vpop.f32.mrb[34].mxu1  ;;  %v2401_v43 = vld [vmem:[%s4978_s8] sm:$0xf] }
 0x632   : > { %v3885_v49 = vpop.f32.mrb[35].mxu1 }
 0x633   : > { %v3592_v49 = vld [vmem:[%s4978_s8 + $0x8] sm:$0xf] }
 0x636   : > { %v2160_v50 = vpop.f32.mrb[36].mxu0 }
 0x637   : > { %v2166_v51 = vadd.f32 %v2160_v50, %v2115_v46  ;;  %v3890_v52 = vpop.f32.mrb[37].mxu0  ;;  %v2215_v53 = vpop.f32.mrb[36].mxu1 }
 0x638   : > { %v2163_v54 = vpop.f32.mrb[38].mxu0  ;;  %v3896_v55 = vpop.f32.mrb[37].mxu1 }
 0x639   : > { %v2221_v56 = vadd.f32 %v2215_v53, %v2166_v51  ;;  %v3891_v57 = vpop.f32.mrb[39].mxu0  ;;  %v2218_v58 = vpop.f32.mrb[38].mxu1  ;;  %v3595_v51 = vld [vmem:[%s4978_s8 + $0xc] sm:$0xf]  ;;  %v3598_v55 = vld [vmem:[%s4978_s8 + $0x10] sm:$0xf] }
 0x63a   : > { %v3897_v59 = vpop.f32.mrb[39].mxu1  ;;  %v3600_v57 = vld [vmem:[%s4978_s8 + $0x14] sm:$0xf] }
 0x63e   : > { %v2270_v61 = vpop.f32.mrb[40].mxu0 }
 0x63f   : > { %v2276_v2 = vadd.f32 %v2270_v61, %v2221_v56  ;;  %v3902_v62 = vpop.f32.mrb[41].mxu0  ;;  %v2321_v63 = vpop.f32.mrb[40].mxu1 }
 0x640   : > { %v2273_v0 = vpop.f32.mrb[42].mxu0  ;;  %v3908_v5 = vpop.f32.mrb[41].mxu1  ;;  %v3606_v62 = vld [vmem:[%s4978_s8 + $0x1c] sm:$0xf] }
 0x641   : > { %v2327_v8 = vadd.f32 %v2321_v63, %v2276_v2  ;;  %v3903_v10 = vpop.f32.mrb[43].mxu0  ;;  %v2324_v11 = vpop.f32.mrb[42].mxu1  ;;  %v3603_v2 = vld [vmem:[%s4978_s8 + $0x18] sm:$0xf]  ;;  %v3608_v0 = vld [vmem:[%s4978_s8 + $0x20] sm:$0xf] }
 0x642   : > { %v3909_v12 = vpop.f32.mrb[43].mxu1 }
 0x646   : > { %v2376_v13 = vpop.f32.mrb[44].mxu0 }
 0x647   : > { %v2382_v14 = vadd.f32 %v2376_v13, %v2327_v8  ;;  %v3914_v16 = vpop.f32.mrb[45].mxu0 }
 0x648   : > { %v2379_v18 = vpop.f32.mrb[46].mxu0 }
 0x649   : > { %v2389_v20 = vadd.f32 %v2387_v17, %v2382_v14  ;;  %v3915_v21 = vpop.f32.mrb[47].mxu0 }
 0x64b   : > { %v4717_v22 = vadd.f32 %v2389_v20, %v4498_v60 }
 0x64d   : > { %v3644_v23 = vpack.c.bf16 %v4717_v22, %v4717_v22 }
 0x64f   : > { %2395 = vrot.lane.b32.xlu1 %v3644_v23, %s5019_s26 }
 0x6c1   : > { %v2396_v24 = vpop.permute.xlu1 %2395 }
 0x6c2   : > { %2398 = vst.msk [vmem:[#allocation2] sm:$0xf] %vm1369_vm6, %v2396_v24 }
 0x6c9   : > { %v2399_v3 = vld [vmem:[#allocation2] sm:$0xf] }
 0x6ca   : > { %v3588_v25 = vcombine.low %v2399_v3, %v2399_v3  ;;  %v2400_v26 = vsel %vm1378_vm7, %v2399_v3, 0  ;;  %v2506_v28 = vsel %vm1493_vm8, %v2399_v3, 0  ;;  %v2561_v60 = vsel %vm1551_vm9, %v2399_v3, 0 }
 0x6cb   : > { %v3590_v27 = vcombine.low %v2400_v26, %v2400_v26  ;;  %v3593_v29 = vcombine.low %v2506_v28, %v2506_v28  ;;  %v3596_v30 = vcombine.low %v2561_v60, %v2561_v60  ;;  %v2667_v31 = vsel %vm1660_vm10, %v2399_v3, 0 }
 0x6cc   : > { %2407 = vrot.lane.b32.xlu0 %v3588_v25, %s5022_s0  ;;  %v3601_v32 = vcombine.low %v2667_v31, %v2667_v31  ;;  %v2722_v33 = vsel %vm1718_vm11, %v2399_v3, 0  ;;  %v2828_v35 = vsel %vm1827_vm12, %v2399_v3, 0 }
 0x6cd   : > { %2458 = vrot.lane.b32.xlu1 %v3590_v27, %s5023_s20  ;;  %v3604_v34 = vcombine.low %v2722_v33, %v2722_v33  ;;  %v3609_v36 = vcombine.low %v2828_v35, %v2828_v35 }
 0x6d0   : > { %2512 = vrot.lane.b32.xlu0 %v3593_v29, %s5024_s21 }
 0x6d1   : > { %2567 = vrot.lane.b32.xlu1 %v3596_v30, %s5025_s25 }
 0x6d4   : > { %2618 = vrot.lane.b32.xlu0 %v3588_v25, %s5031_s2 }
 0x6d5   : > { %2673 = vrot.lane.b32.xlu1 %v3601_v32, %s5026_s18 }
 0x6d8   : > { %2728 = vrot.lane.b32.xlu0 %v3604_v34, %s5027_s27 }
 0x6d9   : > { %2779 = vrot.lane.b32.xlu1 %v3588_v25, %s5028_s1 }
 0x6dc   : > { %2834 = vrot.lane.b32.xlu0 %v3609_v36, %s5029_s4 }
 0x6dd   : > { %2886 = vperm.xlu1 %4119, %v2883_v37  }
 0x73e   : > { %v2408_v38 = vpop.permute.xlu0 %2407 }
 0x73f   : > { %v2413_v39 = vsel %vm1392_vm13, %v2408_v38, 0  ;;  %v2459_v40 = vpop.permute.xlu1 %2458 }
 0x740   : > { %v2464_v41 = vsel %vm1392_vm13, %v2459_v40, 0  ;;  %3917 = vmatpush3.bf16.msra.mxu1 %v2413_v39 }
 0x741   : > { %3923 = vmatpush3.bf16.msra.mxu0 %v2464_v41  ;;  %3928 = vmatprep.subr.bf16.mxu1 %v4191_v4 }
 0x742   : > { %v2513_v44 = vpop.permute.xlu0 %2512  ;;  %3934 = vmatprep.subr.bf16.mxu0 %v4191_v4 }
 0x743   : > { %v2518_v45 = vsel %vm1392_vm13, %v2513_v44, 0  ;;  %3919 = vmatmul.mubr.msk.bf16.vlgmr.msra.gmra.mrb[44].mxu1 %vm1388_vm14, %v3587_v42  ;;  %v2568_v46 = vpop.permute.xlu1 %2567 }
 0x744   : > { %v2573_v47 = vsel %vm1392_vm13, %v2568_v46, 0  ;;  %3925 = vmatmul.mubr.msk.bf16.vlgmr.msra.gmra.mrb[48].mxu0 %vm1388_vm14, %v2401_v43  ;;  %3929 = vmatpush3.bf16.msra.mxu1 %v2518_v45 }
 0x745   : > { %3935 = vmatpush3.bf16.msra.mxu0 %v2573_v47  ;;  %3930 = vmatprep.mubr.msk.bf16.mxu1 %vm4190_vm0, %v4191_v4 }
 0x746   : > { %3940 = vmatprep.subr.bf16.mxu1 %v4191_v4  ;;  %3936 = vmatprep.mubr.msk.bf16.mxu0 %vm4190_vm0, %v4191_v4  ;;  %v2619_v48 = vpop.permute.xlu0 %2618 }
 0x747   : > { %3946 = vmatprep.subr.bf16.mxu0 %v4191_v4  ;;  %v2674_v50 = vpop.permute.xlu1 %2673  ;;  %v2624_v52 = vsel %vm1392_vm13, %v2619_v48, 0 }
 0x748   : > { %v2679_v53 = vsel %vm1392_vm13, %v2674_v50, 0 }
 0x74a   : > { %v2729_v54 = vpop.permute.xlu0 %2728 }
 0x74b   : > { %3931 = vmatmul.mubr.msk.bf16.vlgmr.msra.gmra.mrb[48].mxu1 %vm1388_vm14, %v3592_v49  ;;  %v2780_v56 = vpop.permute.xlu1 %2779  ;;  %v2734_v58 = vsel %vm1392_vm13, %v2729_v54, 0 }
 0x74c   : > { %3941 = vmatpush3.bf16.msra.mxu1 %v2624_v52  ;;  %3937 = vmatmul.mubr.msk.bf16.vlgmr.msra.gmra.mrb[52].mxu0 %vm1388_vm14, %v3595_v51  ;;  %v2785_v59 = vsel %vm1392_vm13, %v2780_v56, 0 }
 0x74d   : > { %3947 = vmatpush3.bf16.msra.mxu0 %v2679_v53  ;;  %3942 = vmatprep.mubr.msk.bf16.mxu1 %vm4190_vm0, %v4191_v4 }
 0x74e   : > { %3952 = vmatprep.subr.bf16.mxu1 %v4191_v4  ;;  %3948 = vmatprep.mubr.msk.bf16.mxu0 %vm4190_vm0, %v4191_v4  ;;  %v2835_v61 = vpop.permute.xlu0 %2834 }
 0x74f   : > { %3958 = vmatprep.subr.bf16.mxu0 %v4191_v4  ;;  %v2840_v63 = vsel %vm1392_vm13, %v2835_v61, 0 }
 0x753   : > { %3943 = vmatmul.mubr.msk.bf16.vlgmr.msra.gmra.mrb[52].mxu1 %vm1388_vm14, %v3598_v55 }
 0x754   : > { %3953 = vmatpush3.bf16.msra.mxu1 %v2734_v58  ;;  %3949 = vmatmul.mubr.msk.bf16.vlgmr.msra.gmra.mrb[56].mxu0 %vm1388_vm14, %v3600_v57 }
 0x755   : > { %3959 = vmatpush3.bf16.msra.mxu0 %v2785_v59  ;;  %3954 = vmatprep.mubr.msk.bf16.mxu1 %vm4190_vm0, %v4191_v4 }
 0x756   : > { %3964 = vmatprep.subr.bf16.mxu1 %v4191_v4  ;;  %3960 = vmatprep.mubr.msk.bf16.mxu0 %vm4190_vm0, %v4191_v4 }
 0x757   : > { %3970 = vmatprep.subr.bf16.mxu0 %v4191_v4 }
 0x75b   : > { %3955 = vmatmul.mubr.msk.bf16.vlgmr.msra.gmra.mrb[56].mxu1 %vm1388_vm14, %v3603_v2 }
 0x75c   : > { %3965 = vmatpush3.bf16.msra.mxu1 %v2840_v63  ;;  %3961 = vmatmul.mubr.msk.bf16.vlgmr.msra.gmra.mrb[60].mxu0 %vm1388_vm14, %v3606_v62  ;;  %v2887_v51 = vpop.permute.xlu1 %2886 }
 0x75d   : > { %3966 = vmatprep.mubr.msk.bf16.mxu1 %vm4190_vm0, %v4191_v4  ;;  %3976 = vmatprep.subr.bf16.mxu1 %v4191_v4 }
 0x75e   : > { %3972 = vmatprep.mubr.msk.bf16.mxu0 %vm4190_vm0, %v4191_v4 }
 0x763   : > { %3967 = vmatmul.mubr.msk.bf16.vlgmr.msra.gmra.mrb[60].mxu1 %vm1388_vm14, %v3608_v0 }
 0x764   : > { %3978 = vmatprep.mubr.msk.bf16.mxu1 %vm4190_vm0, %v4191_v4 }
 0x816   : > { %v2449_v5 = vpop.f32.mrb[44].mxu1 }
 0x817   : > { %v3920_v8 = vpop.f32.mrb[45].mxu1  ;;  %v2500_v10 = vpop.f32.mrb[48].mxu0 }
 0x818   : > { %v2501_v11 = vadd.f32 %v2500_v10, %v2449_v5  ;;  %v2452_v12 = vpop.f32.mrb[46].mxu1  ;;  %v3926_v13 = vpop.f32.mrb[49].mxu0 }
 0x819   : > { %v3921_v14 = vpop.f32.mrb[47].mxu1  ;;  %v2503_v16 = vpop.f32.mrb[50].mxu0 }
 0x81a   : > { %v3927_v17 = vpop.f32.mrb[51].mxu0  ;;  %v3612_v16 = vld [vmem:[%s4980_s10 + $0x4] sm:$0xf] }
 0x81b   : > { %v2901_v17 = vld [vmem:[%s4980_s10] sm:$0xf] }
 0x81e   : > { %v2554_v18 = vpop.f32.mrb[48].mxu1 }
 0x81f   : > { %v2560_v20 = vadd.f32 %v2554_v18, %v2501_v11  ;;  %v3932_v21 = vpop.f32.mrb[49].mxu1  ;;  %v2609_v23 = vpop.f32.mrb[52].mxu0  ;;  %v3383_v11 = vld [vmem:[%s4981_s11] sm:$0xff] }
 0x820   : > { %v2557_v24 = vpop.f32.mrb[50].mxu1  ;;  %v3938_v3 = vpop.f32.mrb[53].mxu0 }
 0x821   : > { %v2615_v25 = vadd.f32 %v2609_v23, %v2560_v20  ;;  %v3933_v26 = vpop.f32.mrb[51].mxu1  ;;  %v2612_v27 = vpop.f32.mrb[54].mxu0  ;;  %v3617_v3 = vld [vmem:[%s4980_s10 + $0x8] sm:$0xf] }
 0x822   : > { %v3939_v28 = vpop.f32.mrb[55].mxu0  ;;  %v3620_v26 = vld [vmem:[%s4980_s10 + $0xc] sm:$0xf] }
 0x826   : > { %v2660_v60 = vpop.f32.mrb[52].mxu1 }
 0x827   : > { %v2666_v29 = vadd.f32 %v2660_v60, %v2615_v25  ;;  %v3944_v30 = vpop.f32.mrb[53].mxu1  ;;  %v2715_v31 = vpop.f32.mrb[56].mxu0 }
 0x828   : > { %v2663_v32 = vpop.f32.mrb[54].mxu1  ;;  %v3950_v33 = vpop.f32.mrb[57].mxu0 }
 0x829   : > { %v2721_v34 = vadd.f32 %v2715_v31, %v2666_v29  ;;  %v3945_v35 = vpop.f32.mrb[55].mxu1  ;;  %v2718_v36 = vpop.f32.mrb[58].mxu0  ;;  %v3623_v29 = vld [vmem:[%s4980_s10 + $0x10] sm:$0xf]  ;;  %v3625_v31 = vld [vmem:[%s4980_s10 + $0x14] sm:$0xf] }
 0x82a   : > { %v3951_v37 = vpop.f32.mrb[59].mxu0  ;;  %v3628_v35 = vld [vmem:[%s4980_s10 + $0x18] sm:$0xf]  ;;  %v3631_v36 = vld [vmem:[%s4980_s10 + $0x1c] sm:$0xf] }
 0x82e   : > { %v2770_v38 = vpop.f32.mrb[56].mxu1 }
 0x82f   : > { %v2776_v39 = vadd.f32 %v2770_v38, %v2721_v34  ;;  %v3956_v40 = vpop.f32.mrb[57].mxu1  ;;  %v2821_v41 = vpop.f32.mrb[60].mxu0  ;;  %v3633_v38 = vld [vmem:[%s4980_s10 + $0x20] sm:$0xf] }
 0x830   : > { %v2773_v42 = vpop.f32.mrb[58].mxu1  ;;  %v3962_v43 = vpop.f32.mrb[61].mxu0 }
 0x831   : > { %v2827_v44 = vadd.f32 %v2821_v41, %v2776_v39  ;;  %v3957_v45 = vpop.f32.mrb[59].mxu1  ;;  %v2824_v46 = vpop.f32.mrb[62].mxu0 }
 0x832   : > { %v3963_v47 = vpop.f32.mrb[63].mxu0 }
 0x836   : > { %v2876_v48 = vpop.f32.mrb[60].mxu1 }
 0x837   : > { %v2882_v49 = vadd.f32 %v2876_v48, %v2827_v44  ;;  %v3968_v50 = vpop.f32.mrb[61].mxu1 }
 0x838   : > { %v2879_v52 = vpop.f32.mrb[62].mxu1 }
 0x839   : > { %v2889_v53 = vadd.f32 %v2887_v51, %v2882_v49  ;;  %v3969_v54 = vpop.f32.mrb[63].mxu1 }
 0x83b   : > { %v2890_v55 = vmax.f32 %v2889_v53, 0.0 }
 0x83d   : > { %v3645_v56 = vpack.c.bf16 %v2890_v55, %v2890_v55 }
 0x83f   : > { %2895 = vrot.lane.b32.xlu0 %v3645_v56, %s5019_s26 }
 0x8b1   : > { %v2896_v57 = vpop.permute.xlu0 %2895 }
 0x8b2   : > { %2898 = vst.msk [vmem:[#allocation2] sm:$0xf] %vm1369_vm6, %v2896_v57 }
 0x8b9   : > { %v2899_v58 = vld [vmem:[#allocation2] sm:$0xf] }
 0x8ba   : > { %v3613_v59 = vcombine.low %v2899_v58, %v2899_v58  ;;  %v2900_v61 = vsel %vm1378_vm7, %v2899_v58, 0  ;;  %v3006_v62 = vsel %vm1493_vm8, %v2899_v58, 0  ;;  %v3061_v63 = vsel %vm1551_vm9, %v2899_v58, 0 }
 0x8bb   : > { %v3615_v2 = vcombine.low %v2900_v61, %v2900_v61  ;;  %v3618_v0 = vcombine.low %v3006_v62, %v3006_v62  ;;  %v3621_v5 = vcombine.low %v3061_v63, %v3061_v63  ;;  %v3167_v8 = vsel %vm1660_vm10, %v2899_v58, 0 }
 0x8bc   : > { %2907 = vrot.lane.b32.xlu1 %v3613_v59, %s5022_s0  ;;  %v3626_v1 = vcombine.low %v3167_v8, %v3167_v8  ;;  %v3222_v6 = vsel %vm1718_vm11, %v2899_v58, 0  ;;  %v3328_v10 = vsel %vm1827_vm12, %v2899_v58, 0  ;;  %s4928_s0 = scalar_lea.hbm %s4984_s14, %s3638_s6 }
 0x8bd   : > { %2958 = vrot.lane.b32.xlu0 %v3615_v2, %s5023_s20  ;;  %v3629_v7 = vcombine.low %v3222_v6, %v3222_v6  ;;  %v3634_v9 = vcombine.low %v3328_v10, %v3328_v10 }
 0x8c0   : > { %3012 = vrot.lane.b32.xlu1 %v3618_v0, %s5024_s21  ;;  %s4215_s21 = smov [#allocation4]  }
 0x8c1   : > { %3067 = vrot.lane.b32.xlu0 %v3621_v5, %s5025_s25 }
 0x8c4   : > { %3118 = vrot.lane.b32.xlu1 %v3613_v59, %s5031_s2  ;;  %s458_s2 = sand.u32 1, %s4179_s30  }
 0x8c5   : > { %3173 = vrot.lane.b32.xlu0 %v3626_v1, %s5026_s18  ;;  %s3524_s3 = sshll.u32 %s458_s2, 3  ;;  %s3448_s17 = scalar_lea.sflag [#allocation5], %s458_s2 }
 0x8c6   : > { %s460_s5 = scalar_lea.vmem [#allocation4], %s3524_s3 }
 0x8c7   : > { %s3461_s22 = sshll.u32 %s460_s5, 4  ;;  %s4930_s22 = int_to_ptr.vmem [resolvable:$true] %s3461_s22 }
 0x8c8   : > { %3228 = vrot.lane.b32.xlu1 %v3629_v7, %s5027_s27  ;;  %s4125_s20 = scalar_lea.vmem %s4930_s22, 128 }
 0x8c9   : > { %3279 = vrot.lane.b32.xlu0 %v3613_v59, %s5028_s1  ;;  %p4126_p11 = scmp.ne.s32.totalorder %s4930_s22, %s4125_s20  ;;  %s4129_s1 = sshll.u32 %s4215_s21, 4  ;;  %s4130_s1 = int_to_ptr.vmem [resolvable:$false] %s4129_s1 }
 0x8ca   : > { %s4131_s27 = scalar_lea.vmem %s4130_s1, 256  ;;  %p4132_p0 = scmp.lt.s32.totalorder %s4930_s22, %s4130_s1 }
 0x8cb   : > { %p4127_p12 = pnand %p4126_p11, %p4329_p5  ;;  %p4133_p1 = scmp.lt.s32.totalorder %s4131_s27, %s4125_s20 }
 0x8cc   : > { %3334 = vrot.lane.b32.xlu1 %v3634_v9, %s5029_s4 }
 0x8cd   : > { %3386 = vperm.xlu0 %4120, %v3383_v11   ;;  %p4128_p13 = pneg %p4127_p12  ;;  %p4134_p2 = por %p4133_p1, %p4132_p0 }
 0x8cf   : > { %p4135_p3 = pnand %p4134_p2, %p4128_p13 }
 0x8d0   : > { %3396 = vperm.xlu1 %4119, %v3393_v15  }
 0x92e   : > { %v2908_v12 = vpop.permute.xlu1 %2907 }
 0x92f   : > { %v2913_v19 = vsel %vm1392_vm13, %v2908_v12, 0  ;;  %v2959_v13 = vpop.permute.xlu0 %2958 }
 0x930   : > { %v2964_v14 = vsel %vm1392_vm13, %v2959_v13, 0  ;;  %3971 = vmatpush3.bf16.msra.mxu0 %v2913_v19 }
 0x931   : > { %3977 = vmatpush3.bf16.msra.mxu1 %v2964_v14  ;;  %3982 = vmatprep.subr.bf16.mxu0 %v4191_v4 }
 0x932   : > { %v3013_v18 = vpop.permute.xlu1 %3012  ;;  %3988 = vmatprep.subr.bf16.mxu1 %v4191_v4 }
 0x933   : > { %v3018_v20 = vsel %vm1392_vm13, %v3013_v18, 0  ;;  %3973 = vmatmul.mubr.msk.bf16.vlgmr.msra.gmra.mrb[64].mxu0 %vm1388_vm14, %v3612_v16  ;;  %v3068_v21 = vpop.permute.xlu0 %3067 }
 0x934   : > { %v3073_v23 = vsel %vm1392_vm13, %v3068_v21, 0  ;;  %3979 = vmatmul.mubr.msk.bf16.vlgmr.msra.gmra.mrb[64].mxu1 %vm1388_vm14, %v2901_v17  ;;  %3983 = vmatpush3.bf16.msra.mxu0 %v3018_v20 }
 0x935   : > { %3989 = vmatpush3.bf16.msra.mxu1 %v3073_v23  ;;  %3984 = vmatprep.mubr.msk.bf16.mxu0 %vm4190_vm0, %v4191_v4 }
 0x936   : > { %3994 = vmatprep.subr.bf16.mxu0 %v4191_v4  ;;  %3990 = vmatprep.mubr.msk.bf16.mxu1 %vm4190_vm0, %v4191_v4  ;;  %v3119_v24 = vpop.permute.xlu1 %3118 }
 0x937   : > { %4000 = vmatprep.subr.bf16.mxu1 %v4191_v4  ;;  %v3174_v25 = vpop.permute.xlu0 %3173  ;;  %v3124_v27 = vsel %vm1392_vm13, %v3119_v24, 0 }
 0x938   : > { %v3179_v28 = vsel %vm1392_vm13, %v3174_v25, 0 }
 0x93a   : > { %v3229_v60 = vpop.permute.xlu1 %3228 }
 0x93b   : > { %3985 = vmatmul.mubr.msk.bf16.vlgmr.msra.gmra.mrb[68].mxu0 %vm1388_vm14, %v3617_v3  ;;  %v3280_v30 = vpop.permute.xlu0 %3279  ;;  %v3234_v32 = vsel %vm1392_vm13, %v3229_v60, 0 }
 0x93c   : > { %3995 = vmatpush3.bf16.msra.mxu0 %v3124_v27  ;;  %3991 = vmatmul.mubr.msk.bf16.vlgmr.msra.gmra.mrb[68].mxu1 %vm1388_vm14, %v3620_v26  ;;  %v3285_v33 = vsel %vm1392_vm13, %v3280_v30, 0  ;;  %v3391_v26 = vld [vmem:[%s4982_s12] sm:$0xf] }
 0x93d   : > { %4001 = vmatpush3.bf16.msra.mxu1 %v3179_v28  ;;  %3996 = vmatprep.mubr.msk.bf16.mxu0 %vm4190_vm0, %v4191_v4 }
 0x93e   : > { %4006 = vmatprep.subr.bf16.mxu0 %v4191_v4  ;;  %4002 = vmatprep.mubr.msk.bf16.mxu1 %vm4190_vm0, %v4191_v4  ;;  %v3335_v34 = vpop.permute.xlu1 %3334 }
 0x93f   : > { %4012 = vmatprep.subr.bf16.mxu1 %v4191_v4  ;;  %v3340_v37 = vsel %vm1392_vm13, %v3335_v34, 0 }
 0x943   : > { %3997 = vmatmul.mubr.msk.bf16.vlgmr.msra.gmra.mrb[72].mxu0 %vm1388_vm14, %v3623_v29 }
 0x944   : > { %4007 = vmatpush3.bf16.msra.mxu0 %v3234_v32  ;;  %4003 = vmatmul.mubr.msk.bf16.vlgmr.msra.gmra.mrb[72].mxu1 %vm1388_vm14, %v3625_v31 }
 0x945   : > { %4013 = vmatpush3.bf16.msra.mxu1 %v3285_v33  ;;  %4008 = vmatprep.mubr.msk.bf16.mxu0 %vm4190_vm0, %v4191_v4 }
 0x946   : > { %4018 = vmatprep.subr.bf16.mxu0 %v4191_v4  ;;  %4014 = vmatprep.mubr.msk.bf16.mxu1 %vm4190_vm0, %v4191_v4 }
 0x947   : > { %4024 = vmatprep.subr.bf16.mxu1 %v4191_v4 }
 0x94b   : > { %4009 = vmatmul.mubr.msk.bf16.vlgmr.msra.gmra.mrb[76].mxu0 %vm1388_vm14, %v3628_v35 }
 0x94c   : > { %4019 = vmatpush3.bf16.msra.mxu0 %v3340_v37  ;;  %4015 = vmatmul.mubr.msk.bf16.vlgmr.msra.gmra.mrb[76].mxu1 %vm1388_vm14, %v3631_v36  ;;  %v3387_v18 = vpop.permute.xlu0 %3386 }
 0x94d   : > { %4020 = vmatprep.mubr.msk.bf16.mxu0 %vm4190_vm0, %v4191_v4  ;;  %4026 = vmatprep.mubr.msk.bf16.mxu1 %vm4190_vm0, %v4191_v4  ;;  %vm3445_vm0 = vcmask 523264  }
 0x94f   : > { %v3397_v27 = vpop.permute.xlu1 %3396 }
 0x953   : > { %4021 = vmatmul.mubr.msk.bf16.vlgmr.msra.gmra.mrb[80].mxu0 %vm1388_vm14, %v3633_v38 }
 0xa06   : > { %v2949_v39 = vpop.f32.mrb[64].mxu0 }
 0xa07   : > { %v3974_v40 = vpop.f32.mrb[65].mxu0  ;;  %v3000_v41 = vpop.f32.mrb[64].mxu1 }
 0xa08   : > { %v3001_v42 = vadd.f32 %v3000_v41, %v2949_v39  ;;  %v2952_v43 = vpop.f32.mrb[66].mxu0  ;;  %v3980_v44 = vpop.f32.mrb[65].mxu1 }
 0xa09   : > { %v3975_v45 = vpop.f32.mrb[67].mxu0  ;;  %v3003_v46 = vpop.f32.mrb[66].mxu1 }
 0xa0a   : > { %v3981_v47 = vpop.f32.mrb[67].mxu1 }
 0xa0e   : > { %v3054_v48 = vpop.f32.mrb[68].mxu0 }
 0xa0f   : > { %v3060_v49 = vadd.f32 %v3054_v48, %v3001_v42  ;;  %v3986_v50 = vpop.f32.mrb[69].mxu0  ;;  %v3109_v51 = vpop.f32.mrb[68].mxu1 }
 0xa10   : > { %v3057_v4 = vpop.f32.mrb[70].mxu0  ;;  %v3992_v52 = vpop.f32.mrb[69].mxu1 }
 0xa11   : > { %v3115_v53 = vadd.f32 %v3109_v51, %v3060_v49  ;;  %v3987_v54 = vpop.f32.mrb[71].mxu0  ;;  %v3112_v55 = vpop.f32.mrb[70].mxu1 }
 0xa12   : > { %v3993_v56 = vpop.f32.mrb[71].mxu1 }
 0xa16   : > { %v3160_v57 = vpop.f32.mrb[72].mxu0 }
 0xa17   : > { %v3166_v58 = vadd.f32 %v3160_v57, %v3115_v53  ;;  %v3998_v59 = vpop.f32.mrb[73].mxu0  ;;  %v3215_v61 = vpop.f32.mrb[72].mxu1 }
 0xa18   : > { %v3163_v2 = vpop.f32.mrb[74].mxu0  ;;  %v4004_v62 = vpop.f32.mrb[73].mxu1 }
 0xa19   : > { %v3221_v63 = vadd.f32 %v3215_v61, %v3166_v58  ;;  %v3999_v0 = vpop.f32.mrb[75].mxu0  ;;  %v3218_v5 = vpop.f32.mrb[74].mxu1 }
 0xa1a   : > { %v4005_v8 = vpop.f32.mrb[75].mxu1 }
 0xa1e   : > { %v3270_v1 = vpop.f32.mrb[76].mxu0 }
 0xa1f   : > { %v3276_v6 = vadd.f32 %v3270_v1, %v3221_v63  ;;  %v4010_v7 = vpop.f32.mrb[77].mxu0  ;;  %v3321_v10 = vpop.f32.mrb[76].mxu1 }
 0xa20   : > { %v3273_v9 = vpop.f32.mrb[78].mxu0  ;;  %v4016_v11 = vpop.f32.mrb[77].mxu1 }
 0xa21   : > { %v3327_v15 = vadd.f32 %v3321_v10, %v3276_v6  ;;  %v4011_v12 = vpop.f32.mrb[79].mxu0  ;;  %v3324_v19 = vpop.f32.mrb[78].mxu1 }
 0xa22   : > { %v4017_v13 = vpop.f32.mrb[79].mxu1 }
 0xa26   : > { %v3376_v14 = vpop.f32.mrb[80].mxu0 }
 0xa27   : > { %v3382_v16 = vadd.f32 %v3376_v14, %v3327_v15  ;;  %v4022_v17 = vpop.f32.mrb[81].mxu0 }
 0xa28   : > { %v3379_v20 = vpop.f32.mrb[82].mxu0 }
 0xa29   : > { %v3389_v21 = vadd.f32 %v3387_v18, %v3382_v16  ;;  %v4023_v23 = vpop.f32.mrb[83].mxu0 }
 0xa2b   : > { %v3390_v24 = vadd.f32 %v3389_v21, %v4717_v22 }
 0xa2d   : > { %v3392_v3 = vpack.c.bf16 %v3390_v24, %v3390_v24 }
 0xa2f   : > { %v3403_v25 = vsel %vm1392_vm13, %v3392_v3, 0 }
 0xa30   : > { %4025 = vmatpush3.bf16.msra.mxu1 %v3403_v25 }
 0xa33   : > { %4027 = vmatmul.mubr.msk.bf16.vlgmr.msra.gmra.mrb[80].mxu1 %vm1388_vm14, %v3391_v26 }
 0xb06   : > { %v3439_v28 = vpop.f32.mrb[80].mxu1 }
 0xb07   : > { %v3440_v22 = vadd.f32 %v3439_v28, %v3397_v27  ;;  %v4028_v60 = vpop.f32.mrb[81].mxu1 }
 0xb08   : > { %v3442_v29 = vpop.f32.mrb[82].mxu1 }
 0xb09   : > { %v4029_v30 = vpop.f32.mrb[83].mxu1  ;;  %3446 = vst.msk [vmem:[%s460_s5] sm:$0xff] %vm3445_vm0, %v3440_v22 }
 0xb0a   : > { %4138 = shalt.err (!%p4135_p3)
}
 0xb0b   : > { %s4139_s4 = scalar_lea.hbm %s4928_s0, 128  ;;  %s4143_s2 = scalar_lea.hbm %s4984_s14, 256 }
 0xb0c   : > { %p4140_p4 = scmp.ne.s32.totalorder %s4928_s0, %s4139_s4  ;;  %p4144_p9 = scmp.lt.u32.totalorder %s4928_s0, %s4984_s14 }
 0xb0d   : > { %p4145_p10 = scmp.lt.u32.totalorder %s4143_s2, %s4139_s4  ;;  %p4147_p12 = scmp.lt.u32.totalorder %s4139_s4, %s4928_s0 }
 0xb0e   : > { %p4141_p7 = pnand %p4140_p4, %p4329_p5 }
 0xb0f   : > { %p4146_p11 = por %p4145_p10, %p4144_p9 }
 0xb10   : > { %p4142_p8 = pneg %p4141_p7 }
 0xb11   : > { %p4148_p13 = por %p4147_p12, %p4146_p11 }
 0xb13   : > { %p4149_p0 = pnand %p4148_p13, %p4142_p8 }
 0xb15   : > { %4152 = shalt.err (!%p4149_p0)
}
 0xb16   : > { %4054 = dma.vmem_to_hbm [thread:$0]  (%p4329_p5), %s4930_s22, 128, %s4928_s0, %s3448_s17  }
 0xb17 PF: > { %p4060_p1 = scmp.ge.s32.totalorder %s4187_s16, 2  ;;  %s3473_s5 = sand.u32 1, %s4175_s29  }
 0xb18   : > { %s3474_s28 = scalar_lea.sflag [#allocation5], %s3473_s5 }
 0xb19   : > { %p4057_p2 = pnand %p4060_p1, %p4333_p6 }
 0xb1b   : > { %4170 = dma.done.wait (!%p4057_p2), %s3474_s28, 128  }
 0xb1c   : > { %4172 = vsyncadd (!%p4057_p2), %s3474_s28, 4294967168  ;;  %s5032_s26 = sld [smem:[#allocation7_spill]]  ;;  %p24_p3 = scmp.ge.s32.totalorder %s4316_s19, 4  }
 0xb1d   : > { %s5033_s29 = smov %s4179_s30  ;;  %s5034_s30 = smov %s4183_s15 }
 0xb1e   : > { %s5036_s16 = smov %s4316_s19  ;;  %26 = sbr.rel (!%p24_p3) target bundleno = 11 (0xb), region = 143 }
 0xb22   : > { %s5035_s15 = smov %s5032_s26 }
 0xb25   :  { %3479 = vsyncpa [#allocation5], 1 }
 0xb26   :  { %3481 = vsyncpa [#allocation5 + $0x1], 1 }

</bundles_post_ra>
